<compile_context>
chip_gen: v7x
topology: tpu7x:2x2x1
jax: 0.10.0
libtpu: 0.0.40
codegen_flags: <defaults>
</compile_context>

<pallas_src>
import functools

import jax
import jax.numpy as jnp
from jax.experimental import pallas as pl
from jax.experimental.pallas import tpu as pltpu

LANE = 128  # TPU lane width; Cout tiles are lane-dense multiples of this.


def _pick_row_block(Ho, Wo, target=8):
    """Largest divisor of Ho <= target whose row-block keeps (RB*Wo) 8-aligned."""
    divs = [d for d in range(1, min(Ho, target) + 1) if Ho % d == 0]
    good = [d for d in divs if (d * Wo) % 8 == 0]
    if good:
        return max(good)
    # Fall back to the full spatial extent (block == full dim is always legal).
    return Ho


def _make_kernel(H, W, Cin, KH, KW, PH, PW, Ho, Wo, RB, TCOUT):
    """x (1,H,W,Cin), w (K,TCOUT) bf16, b (1,TCOUT) -> o (1, RB*Wo, TCOUT)."""
    Hp, Wp = H + 2 * PH, W + 2 * PW

    def kernel(x_ref, w_ref, b_ref, o_ref, xp_ref, col_ref):
        r = pl.program_id(1)          # output row-block index
        c = pl.program_id(2)          # Cout tile index

        # ---- once per batch element: padded activation scratch (bf16) ------
        @pl.when(jnp.logical_and(r == 0, c == 0))
        def _fill_padded():
            dt = xp_ref.dtype
            if PH > 0:                                      # top/bottom halo
                xp_ref[0:PH, :, :] = jnp.zeros((PH, Wp, Cin), dt)
                xp_ref[PH + H:Hp, :, :] = jnp.zeros((PH, Wp, Cin), dt)
            if PW > 0:                                      # left/right halo
                xp_ref[PH:PH + H, 0:PW, :] = jnp.zeros((H, PW, Cin), dt)
                xp_ref[PH:PH + H, PW + W:Wp, :] = jnp.zeros((H, PW, Cin), dt)
            xp_ref[PH:PH + H, PW:PW + W, :] = x_ref[0].astype(dt)

        # ---- once per (batch, row-block): im2col slab by sliced stores -----
        @pl.when(c == 0)
        def _build_col():
            r0 = r * RB
            if RB % 8 == 0:
                r0 = pl.multiple_of(r0, 8)
            for kh in range(KH):
                for kw in range(KW):
                    t = kh * KW + kw
                    tap = xp_ref[pl.ds(r0 + kh, RB), kw:kw + Wo, :]  # (RB,Wo,Cin)
                    col_ref[:, t * Cin:(t + 1) * Cin] = tap.reshape(RB * Wo, Cin)

        # ---- per (batch, row-block, cout-tile): one deep bf16 MXU matmul ---
        acc = jnp.dot(col_ref[...], w_ref[...],
                      preferred_element_type=jnp.float32)   # (RB*Wo, TCOUT) f32
        # BN scale already folded into w; epilogue = add-bias + ReLU only.
        y = jnp.maximum(acc + b_ref[0], 0.0)
        o_ref[0] = y.astype(o_ref.dtype)                    # lane-dense store

    return kernel


@functools.partial(jax.jit, static_argnames=("ksize", "padding", "stride"))
def basic_conv2d_nhwc(x_nhwc, w_flat, scale, bias, *, ksize, padding, stride=(1, 1)):
    """Fused Conv2d(bias=False) + folded BatchNorm2d(eval) + ReLU.  NHWC in/out."""
    # TODO(synk): stride != 1 (Inception v3 has stride-2 convs) not implemented.
    assert stride == (1, 1), "only stride=1 implemented"
    N, H, W, Cin = x_nhwc.shape
    KH, KW = ksize
    PH, PW = padding
    Ho = H + 2 * PH - KH + 1
    Wo = W + 2 * PW - KW + 1
    Kfeat = KH * KW * Cin
    Cout = w_flat.shape[-1]

    # Fold BN scale into the weight columns, cast to bf16 for the MXU, and pad
    # Cout to a lane-dense multiple of 128 so every output store is full-lane.
    # (Tiny weight-sized ops; in a full model precompute these once at load.)
    TCOUT = LANE
    Cout_pad = ((Cout + TCOUT - 1) // TCOUT) * TCOUT
    w_scaled = (w_flat * scale[None, :]).astype(jnp.bfloat16)
    b_used = bias.astype(jnp.float32)
    if Cout_pad != Cout:
        w_scaled = jnp.pad(w_scaled, ((0, 0), (0, Cout_pad - Cout)))
        b_used = jnp.pad(b_used, (0, Cout_pad - Cout))
    b_used = b_used.reshape(1, Cout_pad)

    RB = _pick_row_block(Ho, Wo)
    n_rb = Ho // RB
    n_ct = Cout_pad // TCOUT
    out_dtype = x_nhwc.dtype

    kernel = _make_kernel(H, W, Cin, KH, KW, PH, PW, Ho, Wo, RB, TCOUT)

    # Explicit scoped-VMEM budget: double-buffered operands + scratches + slack.
    itemsize_x = jnp.dtype(x_nhwc.dtype).itemsize
    itemsize_o = jnp.dtype(out_dtype).itemsize
    vmem_bytes = int(
        2 * H * W * Cin * itemsize_x                 # activation block
        + 2 * Kfeat * TCOUT * 2                      # weight tile (bf16)
        + 2 * TCOUT * 4                              # bias tile
        + 2 * RB * Wo * TCOUT * itemsize_o           # output block
        + (H + 2 * PH) * (W + 2 * PW) * Cin * 2      # padded-x scratch (bf16)
        + RB * Wo * Kfeat * 2                        # im2col scratch (bf16)
        + (4 << 20))                                 # headroom
    vmem_bytes = min(max(vmem_bytes, 8 << 20), 48 << 20)

    cost = pl.CostEstimate(
        flops=2 * N * Ho * Wo * Kfeat * Cout_pad,
        transcendentals=0,
        bytes_accessed=(N * H * W * Cin * itemsize_x
                        + Kfeat * Cout_pad * 2
                        + N * Ho * Wo * Cout_pad * itemsize_o))

    out = pl.pallas_call(
        kernel,
        out_shape=jax.ShapeDtypeStruct((N, Ho * Wo, Cout_pad), out_dtype),
        grid=(N, n_rb, n_ct),
        in_specs=[
            # Whole (H,W,Cin) activation per batch element: its block index only
            # depends on n, so it stays VMEM-resident across the row/Cout axes.
            pl.BlockSpec((1, H, W, Cin), lambda n, r, c: (n, 0, 0, 0)),
            pl.BlockSpec((Kfeat, TCOUT), lambda n, r, c: (0, c)),
            pl.BlockSpec((1, TCOUT), lambda n, r, c: (0, c)),
        ],
        out_specs=pl.BlockSpec((1, RB * Wo, TCOUT), lambda n, r, c: (n, r, c)),
        scratch_shapes=[
            pltpu.VMEM((H + 2 * PH, W + 2 * PW, Cin), jnp.bfloat16),  # padded x
            pltpu.VMEM((RB * Wo, Kfeat), jnp.bfloat16),               # im2col slab
        ],
        compiler_params=pltpu.CompilerParams(
            # Batch is parallel (v7x megacore takes one element per core); the
            # row-block / Cout axes carry scratch state -> "arbitrary".
            # TODO(synk): per-row-block halo fill would let the spatial axis be
            # "parallel" too (better v7x utilisation at batch=1).
            dimension_semantics=("parallel", "arbitrary", "arbitrary"),
            vmem_limit_bytes=vmem_bytes),
        cost_estimate=cost,
    )(x_nhwc, w_scaled, b_used)

    out = out.reshape(N, Ho, Wo, Cout_pad)      # contiguous reshape: no copy
    if Cout_pad != Cout:
        out = out[..., :Cout]
    return out


@functools.partial(jax.jit, static_argnames=("ksize", "padding", "stride"))
def basic_conv2d(x_nchw, w_flat, scale, bias, *, ksize, padding, stride=(1, 1)):
    """Torch-parity entry point (NCHW in/out).

    For multi-layer use keep activations NHWC and call basic_conv2d_nhwc
    directly; these transposes are per-layer HBM round trips.
    """
    x = jnp.transpose(x_nchw, (0, 2, 3, 1))
    y = basic_conv2d_nhwc(x, w_flat, scale, bias,
                          ksize=ksize, padding=padding, stride=stride)
    return jnp.transpose(y, (0, 3, 1, 2))


# ----------------------------------------------------------------------------
# Deterministic synthetic parameters (BN folded into per-channel scale/bias)
# ----------------------------------------------------------------------------
def init_basic_conv2d(key, cin, cout, kh, kw):
    k_w, k_g, k_b, k_m, k_v = jax.random.split(key, 5)
    # torch Conv2d weight is (Cout, Cin, KH, KW); flatten to the (KH*KW*Cin, Cout)
    # im2col layout the kernel consumes.
    w_oihw = (jax.random.normal(k_w, (cout, cin, kh, kw), jnp.float32)
              / jnp.sqrt(cin * kh * kw))
    w_flat = jnp.transpose(w_oihw, (2, 3, 1, 0)).reshape(kh * kw * cin, cout)
    gamma = 1.0 + 0.1 * jax.random.normal(k_g, (cout,), jnp.float32)
    beta = 0.1 * jax.random.normal(k_b, (cout,), jnp.float32)
    mean = 0.1 * jax.random.normal(k_m, (cout,), jnp.float32)
    var = jax.random.uniform(k_v, (cout,), jnp.float32, minval=0.5, maxval=1.5)
    eps = 1e-5
    scale = gamma / jnp.sqrt(var + eps)
    bias = beta - mean * scale
    return {"w": w_flat, "scale": scale, "bias": bias}


def reference_forward(x_nchw, w_flat, scale, bias, *, ksize, padding):
    """Pure-JAX reference (XLA conv, HIGHEST precision) for a sanity check."""
    KH, KW = ksize
    _, Cin, _, _ = x_nchw.shape
    Cout = w_flat.shape[-1]
    w_hwio = w_flat.reshape(KH, KW, Cin, Cout)
    y = jax.lax.conv_general_dilated(
        x_nchw, w_hwio, window_strides=(1, 1),
        padding=((padding[0], padding[0]), (padding[1], padding[1])),
        dimension_numbers=("NCHW", "HWIO", "NCHW"),
        precision=jax.lax.Precision.HIGHEST)
    y = y * scale[None, :, None, None] + bias[None, :, None, None]
    return jnp.maximum(y, 0.0)


# ----------------------------------------------------------------------------
if __name__ == "__main__":
    # e.g. BasicConv2d(4, 128, kernel_size=3, padding=1) at small spatial size.
    N, Cin, H, W = 2, 4, 16, 16
    Cout, KH, KW, PH, PW = 128, 3, 3, 1, 1

    key = jax.random.PRNGKey(0)
    k_x, k_p = jax.random.split(key)
    x = jax.random.normal(k_x, (N, Cin, H, W), jnp.float32)
    params = init_basic_conv2d(k_p, Cin, Cout, KH, KW)

    y = basic_conv2d(x, params["w"], params["scale"], params["bias"],
                     ksize=(KH, KW), padding=(PH, PW))
    y = jax.block_until_ready(y)

    assert y.shape == (N, Cout, H, W), y.shape
    assert bool(jnp.all(jnp.isfinite(y)))
    assert bool(jnp.all(y >= 0.0))  # ReLU output

    y_ref = reference_forward(x, params["w"], params["scale"], params["bias"],
                              ksize=(KH, KW), padding=(PH, PW))
    max_err = float(jnp.max(jnp.abs(y - y_ref)))
    # bf16 MXU operands with f32 accumulation vs an f32 HIGHEST-precision ref.
    assert bool(jnp.allclose(y, y_ref, rtol=2e-2, atol=3e-2)), max_err

    print("KERNEL_OK")
</pallas_src>

<mosaic_0001>
module attributes {stable_mosaic.version = 11 : i64} {
  func.func @kernel(%arg0: i32, %arg1: i32, %arg2: i32, %arg3: memref<1x16x16x4xf32, #tpu.memory_space<vmem>>, %arg4: memref<36x128xbf16, #tpu.memory_space<vmem>>, %arg5: memref<1x128xf32, #tpu.memory_space<vmem>>, %arg6: memref<1x128x128xf32, #tpu.memory_space<vmem>>, %arg7: memref<18x18x4xbf16, #tpu.memory_space<vmem>>, %arg8: memref<128x36xbf16, #tpu.memory_space<vmem>>) attributes {dimension_semantics = [#tpu.dimension_semantics<parallel>, #tpu.dimension_semantics<arbitrary>, #tpu.dimension_semantics<arbitrary>], iteration_bounds = array<i64: 2, 2, 1>, scalar_prefetch = 0 : i64, scratch_operands = 2 : i64, tpu.core_type = #tpu.core_type<tc>, window_params = [{transform_indices = @transform_0, window_bounds = array<i64: 1, 16, 16, 4>}, {transform_indices = @transform_1, window_bounds = array<i64: 36, 128>}, {transform_indices = @transform_2, window_bounds = array<i64: 1, 128>}, {transform_indices = @transform_3, window_bounds = array<i64: 1, 128, 128>}]} {
    %c0_i32 = arith.constant 0 : i32
    %0 = arith.cmpi eq, %arg1, %c0_i32 : i32
    %c0_i32_0 = arith.constant 0 : i32
    %1 = arith.cmpi eq, %arg2, %c0_i32_0 : i32
    %2 = arith.andi %0, %1 : i1
    %3 = arith.extui %2 : i1 to i32
    %c0_i32_1 = arith.constant 0 : i32
    %4 = arith.cmpi ne, %3, %c0_i32_1 : i32
    scf.if %4 {
      %cst_13 = arith.constant 0.000000e+00 : bf16
      %21 = vector.broadcast %cst_13 : bf16 to vector<1x18x4xbf16>
      %c0_14 = arith.constant 0 : index
      %c0_15 = arith.constant 0 : index
      %c0_16 = arith.constant 0 : index
      %22 = vector.load %arg7[%c0_14, %c0_15, %c0_16] : memref<18x18x4xbf16, #tpu.memory_space<vmem>>, vector<1x18x4xbf16>
      tpu.vector_store %arg7[%c0_14, %c0_15, %c0_16], %21 {strides = array<i32>} : memref<18x18x4xbf16, #tpu.memory_space<vmem>>, vector<1x18x4xbf16>,
      %cst_17 = arith.constant 0.000000e+00 : bf16
      %23 = vector.broadcast %cst_17 : bf16 to vector<1x18x4xbf16>
      %c17 = arith.constant 17 : index
      %c0_18 = arith.constant 0 : index
      %c0_19 = arith.constant 0 : index
      %24 = vector.load %arg7[%c17, %c0_18, %c0_19] : memref<18x18x4xbf16, #tpu.memory_space<vmem>>, vector<1x18x4xbf16>
      tpu.vector_store %arg7[%c17, %c0_18, %c0_19], %23 {strides = array<i32>} : memref<18x18x4xbf16, #tpu.memory_space<vmem>>, vector<1x18x4xbf16>,
      %cst_20 = arith.constant 0.000000e+00 : bf16
      %25 = vector.broadcast %cst_20 : bf16 to vector<16x1x4xbf16>
      %c1 = arith.constant 1 : index
      %c0_21 = arith.constant 0 : index
      %c0_22 = arith.constant 0 : index
      %26 = vector.load %arg7[%c1, %c0_21, %c0_22] : memref<18x18x4xbf16, #tpu.memory_space<vmem>>, vector<16x1x4xbf16>
      tpu.vector_store %arg7[%c1, %c0_21, %c0_22], %25 {strides = array<i32>} : memref<18x18x4xbf16, #tpu.memory_space<vmem>>, vector<16x1x4xbf16>,
      %cst_23 = arith.constant 0.000000e+00 : bf16
      %27 = vector.broadcast %cst_23 : bf16 to vector<16x1x4xbf16>
      %c1_24 = arith.constant 1 : index
      %c17_25 = arith.constant 17 : index
      %c0_26 = arith.constant 0 : index
      %28 = vector.load %arg7[%c1_24, %c17_25, %c0_26] : memref<18x18x4xbf16, #tpu.memory_space<vmem>>, vector<16x1x4xbf16>
      tpu.vector_store %arg7[%c1_24, %c17_25, %c0_26], %27 {strides = array<i32>} : memref<18x18x4xbf16, #tpu.memory_space<vmem>>, vector<16x1x4xbf16>,
      %c0_27 = arith.constant 0 : index
      %c0_28 = arith.constant 0 : index
      %c0_29 = arith.constant 0 : index
      %c0_30 = arith.constant 0 : index
      %29 = vector.load %arg3[%c0_27, %c0_28, %c0_29, %c0_30] : memref<1x16x16x4xf32, #tpu.memory_space<vmem>>, vector<1x16x16x4xf32>
      %30 = vector.shape_cast %29 : vector<1x16x16x4xf32> to vector<16x16x4xf32>
      %31 = arith.truncf %30 : vector<16x16x4xf32> to vector<16x16x4xbf16>
      %c1_31 = arith.constant 1 : index
      %c1_32 = arith.constant 1 : index
      %c0_33 = arith.constant 0 : index
      %32 = vector.load %arg7[%c1_31, %c1_32, %c0_33] : memref<18x18x4xbf16, #tpu.memory_space<vmem>>, vector<16x16x4xbf16>
      tpu.vector_store %arg7[%c1_31, %c1_32, %c0_33], %31 {strides = array<i32>} : memref<18x18x4xbf16, #tpu.memory_space<vmem>>, vector<16x16x4xbf16>,
    } else {
    }
    %c0_i32_2 = arith.constant 0 : i32
    %5 = arith.cmpi eq, %arg2, %c0_i32_2 : i32
    %6 = arith.extui %5 : i1 to i32
    %c0_i32_3 = arith.constant 0 : i32
    %7 = arith.cmpi ne, %6, %c0_i32_3 : i32
    scf.if %7 {
      %c8_i32 = arith.constant 8 : i32
      %21 = arith.muli %arg1, %c8_i32 : i32
      %22 = tpu.assume_multiple %21, 8 : i32
      %c0_i32_13 = arith.constant 0 : i32
      %23 = arith.addi %22, %c0_i32_13 : i32
      %24 = arith.index_cast %23 : i32 to index
      %c0_14 = arith.constant 0 : index
      %c0_15 = arith.constant 0 : index
      %25 = vector.load %arg7[%24, %c0_14, %c0_15] : memref<18x18x4xbf16, #tpu.memory_space<vmem>>, vector<8x16x4xbf16>
      %26 = vector.shape_cast %25 : vector<8x16x4xbf16> to vector<128x4xbf16>
      %c0_16 = arith.constant 0 : index
      %c0_17 = arith.constant 0 : index
      %27 = vector.load %arg8[%c0_16, %c0_17] : memref<128x36xbf16, #tpu.memory_space<vmem>>, vector<128x4xbf16>
      tpu.vector_store %arg8[%c0_16, %c0_17], %26 {strides = array<i32>} : memref<128x36xbf16, #tpu.memory_space<vmem>>, vector<128x4xbf16>,
      %c0_i32_18 = arith.constant 0 : i32
      %28 = arith.addi %22, %c0_i32_18 : i32
      %29 = arith.index_cast %28 : i32 to index
      %c1 = arith.constant 1 : index
      %c0_19 = arith.constant 0 : index
      %30 = vector.load %arg7[%29, %c1, %c0_19] : memref<18x18x4xbf16, #tpu.memory_space<vmem>>, vector<8x16x4xbf16>
      %31 = vector.shape_cast %30 : vector<8x16x4xbf16> to vector<128x4xbf16>
      %c0_20 = arith.constant 0 : index
      %c4 = arith.constant 4 : index
      %32 = vector.load %arg8[%c0_20, %c4] : memref<128x36xbf16, #tpu.memory_space<vmem>>, vector<128x4xbf16>
      tpu.vector_store %arg8[%c0_20, %c4], %31 {strides = array<i32>} : memref<128x36xbf16, #tpu.memory_space<vmem>>, vector<128x4xbf16>,
      %c0_i32_21 = arith.constant 0 : i32
      %33 = arith.addi %22, %c0_i32_21 : i32
      %34 = arith.index_cast %33 : i32 to index
      %c2 = arith.constant 2 : index
      %c0_22 = arith.constant 0 : index
      %35 = vector.load %arg7[%34, %c2, %c0_22] : memref<18x18x4xbf16, #tpu.memory_space<vmem>>, vector<8x16x4xbf16>
      %36 = vector.shape_cast %35 : vector<8x16x4xbf16> to vector<128x4xbf16>
      %c0_23 = arith.constant 0 : index
      %c8 = arith.constant 8 : index
      %37 = vector.load %arg8[%c0_23, %c8] : memref<128x36xbf16, #tpu.memory_space<vmem>>, vector<128x4xbf16>
      tpu.vector_store %arg8[%c0_23, %c8], %36 {strides = array<i32>} : memref<128x36xbf16, #tpu.memory_space<vmem>>, vector<128x4xbf16>,
      %c1_i32 = arith.constant 1 : i32
      %38 = arith.addi %22, %c1_i32 : i32
      %39 = arith.index_cast %38 : i32 to index
      %c0_24 = arith.constant 0 : index
      %c0_25 = arith.constant 0 : index
      %40 = vector.load %arg7[%39, %c0_24, %c0_25] : memref<18x18x4xbf16, #tpu.memory_space<vmem>>, vector<8x16x4xbf16>
      %41 = vector.shape_cast %40 : vector<8x16x4xbf16> to vector<128x4xbf16>
      %c0_26 = arith.constant 0 : index
      %c12 = arith.constant 12 : index
      %42 = vector.load %arg8[%c0_26, %c12] : memref<128x36xbf16, #tpu.memory_space<vmem>>, vector<128x4xbf16>
      tpu.vector_store %arg8[%c0_26, %c12], %41 {strides = array<i32>} : memref<128x36xbf16, #tpu.memory_space<vmem>>, vector<128x4xbf16>,
      %c1_i32_27 = arith.constant 1 : i32
      %43 = arith.addi %22, %c1_i32_27 : i32
      %44 = arith.index_cast %43 : i32 to index
      %c1_28 = arith.constant 1 : index
      %c0_29 = arith.constant 0 : index
      %45 = vector.load %arg7[%44, %c1_28, %c0_29] : memref<18x18x4xbf16, #tpu.memory_space<vmem>>, vector<8x16x4xbf16>
      %46 = vector.shape_cast %45 : vector<8x16x4xbf16> to vector<128x4xbf16>
      %c0_30 = arith.constant 0 : index
      %c16 = arith.constant 16 : index
      %47 = vector.load %arg8[%c0_30, %c16] : memref<128x36xbf16, #tpu.memory_space<vmem>>, vector<128x4xbf16>
      tpu.vector_store %arg8[%c0_30, %c16], %46 {strides = array<i32>} : memref<128x36xbf16, #tpu.memory_space<vmem>>, vector<128x4xbf16>,
      %c1_i32_31 = arith.constant 1 : i32
      %48 = arith.addi %22, %c1_i32_31 : i32
      %49 = arith.index_cast %48 : i32 to index
      %c2_32 = arith.constant 2 : index
      %c0_33 = arith.constant 0 : index
      %50 = vector.load %arg7[%49, %c2_32, %c0_33] : memref<18x18x4xbf16, #tpu.memory_space<vmem>>, vector<8x16x4xbf16>
      %51 = vector.shape_cast %50 : vector<8x16x4xbf16> to vector<128x4xbf16>
      %c0_34 = arith.constant 0 : index
      %c20 = arith.constant 20 : index
      %52 = vector.load %arg8[%c0_34, %c20] : memref<128x36xbf16, #tpu.memory_space<vmem>>, vector<128x4xbf16>
      tpu.vector_store %arg8[%c0_34, %c20], %51 {strides = array<i32>} : memref<128x36xbf16, #tpu.memory_space<vmem>>, vector<128x4xbf16>,
      %c2_i32 = arith.constant 2 : i32
      %53 = arith.addi %22, %c2_i32 : i32
      %54 = arith.index_cast %53 : i32 to index
      %c0_35 = arith.constant 0 : index
      %c0_36 = arith.constant 0 : index
      %55 = vector.load %arg7[%54, %c0_35, %c0_36] : memref<18x18x4xbf16, #tpu.memory_space<vmem>>, vector<8x16x4xbf16>
      %56 = vector.shape_cast %55 : vector<8x16x4xbf16> to vector<128x4xbf16>
      %c0_37 = arith.constant 0 : index
      %c24 = arith.constant 24 : index
      %57 = vector.load %arg8[%c0_37, %c24] : memref<128x36xbf16, #tpu.memory_space<vmem>>, vector<128x4xbf16>
      tpu.vector_store %arg8[%c0_37, %c24], %56 {strides = array<i32>} : memref<128x36xbf16, #tpu.memory_space<vmem>>, vector<128x4xbf16>,
      %c2_i32_38 = arith.constant 2 : i32
      %58 = arith.addi %22, %c2_i32_38 : i32
      %59 = arith.index_cast %58 : i32 to index
      %c1_39 = arith.constant 1 : index
      %c0_40 = arith.constant 0 : index
      %60 = vector.load %arg7[%59, %c1_39, %c0_40] : memref<18x18x4xbf16, #tpu.memory_space<vmem>>, vector<8x16x4xbf16>
      %61 = vector.shape_cast %60 : vector<8x16x4xbf16> to vector<128x4xbf16>
      %c0_41 = arith.constant 0 : index
      %c28 = arith.constant 28 : index
      %62 = vector.load %arg8[%c0_41, %c28] : memref<128x36xbf16, #tpu.memory_space<vmem>>, vector<128x4xbf16>
      tpu.vector_store %arg8[%c0_41, %c28], %61 {strides = array<i32>} : memref<128x36xbf16, #tpu.memory_space<vmem>>, vector<128x4xbf16>,
      %c2_i32_42 = arith.constant 2 : i32
      %63 = arith.addi %22, %c2_i32_42 : i32
      %64 = arith.index_cast %63 : i32 to index
      %c2_43 = arith.constant 2 : index
      %c0_44 = arith.constant 0 : index
      %65 = vector.load %arg7[%64, %c2_43, %c0_44] : memref<18x18x4xbf16, #tpu.memory_space<vmem>>, vector<8x16x4xbf16>
      %66 = vector.shape_cast %65 : vector<8x16x4xbf16> to vector<128x4xbf16>
      %c0_45 = arith.constant 0 : index
      %c32 = arith.constant 32 : index
      %67 = vector.load %arg8[%c0_45, %c32] : memref<128x36xbf16, #tpu.memory_space<vmem>>, vector<128x4xbf16>
      tpu.vector_store %arg8[%c0_45, %c32], %66 {strides = array<i32>} : memref<128x36xbf16, #tpu.memory_space<vmem>>, vector<128x4xbf16>,
    } else {
    }
    %c0 = arith.constant 0 : index
    %c0_4 = arith.constant 0 : index
    %8 = vector.load %arg8[%c0, %c0_4] : memref<128x36xbf16, #tpu.memory_space<vmem>>, vector<128x36xbf16>
    %c0_5 = arith.constant 0 : index
    %c0_6 = arith.constant 0 : index
    %9 = vector.load %arg4[%c0_5, %c0_6] : memref<36x128xbf16, #tpu.memory_space<vmem>>, vector<36x128xbf16>
    %cst = arith.constant dense<0.000000e+00> : vector<128x128xf32>
    %10 = tpu.matmul %8, %9, %cst {dimension_numbers = #tpu.dot_dimension_numbers<[1], [0], [0], [1], [0, 0, 1, 1], [], []>} : vector<128x36xbf16>, vector<36x128xbf16>, vector<128x128xf32> -> vector<128x128xf32>
    %c0_7 = arith.constant 0 : index
    %c0_8 = arith.constant 0 : index
    %11 = vector.load %arg5[%c0_7, %c0_8] : memref<1x128xf32, #tpu.memory_space<vmem>>, vector<1x128xf32>
    %12 = vector.shape_cast %11 : vector<1x128xf32> to vector<128xf32>
    %13 = vector.shape_cast %12 : vector<128xf32> to vector<1x128xf32>
    %14 = vector.broadcast %13 : vector<1x128xf32> to vector<128x128xf32>
    %15 = arith.addf %10, %14 : vector<128x128xf32>
    %cst_9 = arith.constant 0.000000e+00 : f32
    %16 = vector.broadcast %cst_9 : f32 to vector<128x128xf32>
    %17 = arith.maximumf %15, %16 : vector<128x128xf32>
    %c0_10 = arith.constant 0 : index
    %c0_11 = arith.constant 0 : index
    %c0_12 = arith.constant 0 : index
    %18 = vector.load %arg6[%c0_10, %c0_11, %c0_12] : memref<1x128x128xf32, #tpu.memory_space<vmem>>, vector<1x128x128xf32>
    %19 = vector.shape_cast %18 : vector<1x128x128xf32> to vector<128x128xf32>
    %20 = vector.shape_cast %17 : vector<128x128xf32> to vector<1x128x128xf32>
    tpu.vector_store %arg6[%c0_10, %c0_11, %c0_12], %20 {strides = array<i32>} : memref<1x128x128xf32, #tpu.memory_space<vmem>>, vector<1x128x128xf32>,
    return
  }
  func.func @transform_0(%arg0: i32, %arg1: i32, %arg2: i32) -> (i32, i32, i32, i32) {
    %c0_i32 = arith.constant 0 : i32
    %c0_i32_0 = arith.constant 0 : i32
    %c0_i32_1 = arith.constant 0 : i32
    %c0_i32_2 = arith.constant 0 : i32
    return %arg0, %c0_i32, %c0_i32_0, %c0_i32_1 : i32, i32, i32, i32
  }
  func.func @transform_1(%arg0: i32, %arg1: i32, %arg2: i32) -> (i32, i32) {
    %c0_i32 = arith.constant 0 : i32
    %c0_i32_0 = arith.constant 0 : i32
    return %c0_i32, %arg2 : i32, i32
  }
  func.func @transform_2(%arg0: i32, %arg1: i32, %arg2: i32) -> (i32, i32) {
    %c0_i32 = arith.constant 0 : i32
    %c0_i32_0 = arith.constant 0 : i32
    return %c0_i32, %arg2 : i32, i32
  }
  func.func @transform_3(%arg0: i32, %arg1: i32, %arg2: i32) -> (i32, i32, i32) {
    %c0_i32 = arith.constant 0 : i32
    return %arg0, %arg1, %arg2 : i32, i32, i32
  }
}

</mosaic_0001>

<bundles_post_ra>
// kernel: basic_conv2d_nhwc.1
= control target key start
LH: loop header
LB: loop body
LE: loop exit
PB: predicated region body
PF: predicated region fallthrough
CT: control target
= control target key end

     0   :  { %8 = vsyncpa [#allocation5], 0  ;;  %s4364_s0 = inlined_call_operand.vmem [shape: f32[2,16,16,4], index: 0, kind: input, shape index: {}]   ;;  %s4365_s1 = inlined_call_operand.vmem [shape: bf16[36,128], index: 1, kind: input, shape index: {}]   ;;  %s4366_s2 = inlined_call_operand.vmem [shape: f32[1,128], index: 2, kind: input, shape index: {}]   ;;  %s4367_s3 = inlined_call_operand.hbm [shape: f32[2,256,128], index: 3, kind: output, shape index: {}]  }
   0x1   :  { %10 = vsyncpa [#allocation5 + $0x1], 0  ;;  %s3410_s12 = smov 0   ;;  %s3412_s13 = smov 0  }
   0x2   :  { %s3414_s14 = smov 0   ;;  %s3416_s15 = smov 0  }
   0x3   :  { %s3418_s16 = smov 0   ;;  %s3420_s17 = smov 0  }
   0x4   :  { %s3422_s18 = smov 0   ;;  %s3424_s19 = smov 0  }
   0x5 LB: > { %s2807_s20 = sadd.s32 4294967295, %s3377_s19   ;;  %s2808_s21 = sadd.s32 4294967294, %s3377_s19   ;;  %s3377_s19 = sphi %s3424_s19, %s16_s19   ;;  %s3373_s18 = sphi %s3422_s18, %s4388_s18   ;;  %s3369_s17 = sphi %s3420_s17, %s4387_s17   ;;  %s3365_s16 = sphi %s3418_s16, %s4386_s16   ;;  %s3361_s15 = sphi %s3416_s15, %s4385_s15   ;;  %s3357_s14 = sphi %s3414_s14, %s4384_s14   ;;  %s3353_s13 = sphi %s3412_s13, %s4383_s13   ;;  %s3349_s12 = sphi %s3410_s12, %s4382_s12  }
   0x6   : > { %s31_s22 = sadd.s32 1, %s3369_s17  ;;  %s35_s23 = sadd.s32 1, %s3373_s18 }
   0x7   : > { %p33_p0 = scmp.ge.s32.totalorder %s31_s22, 2  ;;  %p134_p1 = scmp.ne.s32.totalorder %s3357_s14, %s3353_s13 }
   0x8   : > { %p135_p2 = scmp.eq.s32.totalorder %s2807_s20, 3  ;;  %p140_p5 = scmp.ne.s32.totalorder %s3353_s13, %s3349_s12 }
   0x9   : > { %s4390_s22 = smov (%p33_p0, %s31_s22), 0  ;;  %s4392_s23 = smov (!%p33_p0, %s35_s23), %s3373_s18 }
   0xa   : > { %s118_s24 = ssub.s32 %s3369_s17, %s4390_s22  ;;  %p3461_p3 = por %p135_p2, %p134_p1 }
   0xb   : > { %p37_p4 = scmp.ge.s32.totalorder %s4392_s23, 2  ;;  %p141_p6 = scmp.eq.s32.totalorder %s2808_s21, 3 }
   0xc   : > { %p2813_p7 = scmp.ge.s32.totalorder %s3377_s19, 1  ;;  %p180_p9 = scmp.lt.s32.totalorder %s3377_s19, 5 }
   0xd   : > { %s4394_s23 = smov (%p37_p4, %s4392_s23), 0  ;;  %p3470_p8 = por %p141_p6, %p140_p5 }
   0xe   : > { %s117_s27 = ssub.s32 %s3373_s18, %s4394_s23  ;;  %s124_s28 = sadd.s32 1, %s3357_s14 }
   0xf   : > { %s119_s29 = sor.u32 %s118_s24, %s117_s27  ;;  %p181_p10 = pnand %p2813_p7, %p180_p9 }
  0x10   : > { %p122_p11 = scmp.eq.s32.totalorder %s119_s29, 0  ;;  %s208_s4 = sand.u32 (!%p181_p10), 1, %s3353_s13  }
  0x11   : > { %184 = sbr.rel (%p181_p10) target bundleno = 637 (0x27d), region = 32  ;;  %p211_p12 = scmp.lt.s32.totalorder (!%p181_p10), %s3365_s16, 1 }
  0x12   : > { %s3479_s30 = scalar_select %p122_p11, %s3357_s14, %s124_s28  }
  0x13   : > { %s2814_s5 = sshll.u32 (!%p181_p10), %s208_s4, 7  ;;  %p225_p13 = scmp.eq.s32.totalorder (!%p181_p10), %s3361_s15, 0 }
  0x14   : > { %s3492_s11 = scalar_lea.vmem (!%p181_p10), [#allocation4], %s2814_s5 }
  0x18   : > { %s212_s6 = scalar_select %p211_p12, %s3365_s16, 1 }
  0x19   : > { %230 = sbr.rel (!%p225_p13) target bundleno = 119 (0x77), region = 36  ;;  %vm234_vm0 = vcmask (%p225_p13), 24576   ;;  %vm242_vm1 = vsmask.f32 (%p225_p13), 256  ;;  %v244_v0 = vld [vmem:[#allocation2 + $0xc] sm:$0x1] (%p225_p13) }
  0x1a   : > { %s3099_s7 = sshll.u32 %s212_s6, 8  ;;  %vm231_vm2 = vcmask (%p225_p13), 27648   ;;  %vm3496_vm3 = vmand (%p225_p13), %vm234_vm0, %vm242_vm1  ;;  %v247_v2 = vld [vmem:[#allocation2 + $0x18] sm:$0x1] (%p225_p13)  ;;  %v250_v3 = vld [vmem:[#allocation2 + $0x24] sm:$0x1] (%p225_p13) }
  0x1b   : > { %s3490_s10 = scalar_lea.vmem %s4364_s0, %s3099_s7  ;;  %vm292_vm4 = vsmask.f32 (%p225_p13), 7938  ;;  %v245_v4 = vsel (%p225_p13), %vm3496_vm3, 0, %v244_v0  ;;  %v248_v5 = vsel (%p225_p13), %vm3496_vm3, 0, %v247_v2  ;;  %v251_v6 = vsel (%p225_p13), %vm3496_vm3, 0, %v250_v3 }
  0x1c   : > { %v253_v7 = vld [vmem:[#allocation2 + $0x30] sm:$0x1] (%p225_p13)  ;;  %246 = vst [vmem:[#allocation2 + $0xc] sm:$0x1] (%p225_p13), %v245_v4  ;;  %249 = vst [vmem:[#allocation2 + $0x18] sm:$0x1] (%p225_p13), %v248_v5 }
  0x1d   : > { %252 = vst [vmem:[#allocation2 + $0x24] sm:$0x1] (%p225_p13), %v251_v6  ;;  %v254_v8 = vsel (%p225_p13), %vm3496_vm3, 0, %v253_v7  ;;  %v256_v9 = vld [vmem:[#allocation2 + $0x3c] sm:$0x1] (%p225_p13)  ;;  %v3379_v11 = vmov (%p225_p13), 0   ;;  %vm3532_vm5 = vmand (%p225_p13), %vm234_vm0, %vm292_vm4 }
  0x1e   : > { %v259_v10 = vld [vmem:[#allocation2 + $0x48] sm:$0x1] (%p225_p13)  ;;  %232 = vst.msk [vmem:[#allocation2] sm:$0xf] (%p225_p13), %vm231_vm2, %v3379_v11  ;;  %233 = vst.msk [vmem:[#allocation2 + $0x4] sm:$0xf] (%p225_p13), %vm231_vm2, %v3379_v11 }
  0x1f   : > { %235 = vst.msk [vmem:[#allocation2 + $0x8] sm:$0x1] (%p225_p13), %vm234_vm0, %v3379_v11  ;;  %239 = vst.msk [vmem:[#allocation2 + $0xd4] sm:$0x1] (%p225_p13), %vm234_vm0, %v3379_v11  ;;  %v257_v12 = vsel (%p225_p13), %vm3496_vm3, 0, %v256_v9  ;;  %v260_v13 = vsel (%p225_p13), %vm3496_vm3, 0, %v259_v10 }
  0x20   : > { %237 = vst.msk [vmem:[#allocation2 + $0xcc] sm:$0xf] %vm231_vm2, %v3379_v11  ;;  %238 = vst.msk [vmem:[#allocation2 + $0xd0] sm:$0xf] %vm231_vm2, %v3379_v11  ;;  %v262_v14 = vld [vmem:[#allocation2 + $0x54] sm:$0x1] }
  0x21   : > { %255 = vst [vmem:[#allocation2 + $0x30] sm:$0x1] %v254_v8  ;;  %v265_v15 = vld [vmem:[#allocation2 + $0x60] sm:$0x1]  ;;  %258 = vst [vmem:[#allocation2 + $0x3c] sm:$0x1] %v257_v12 }
  0x22   : > { %261 = vst [vmem:[#allocation2 + $0x48] sm:$0x1] %v260_v13  ;;  %v263_v16 = vsel %vm3496_vm3, 0, %v262_v14  ;;  %v266_v17 = vsel %vm3496_vm3, 0, %v265_v15  ;;  %v268_v18 = vld [vmem:[#allocation2 + $0x6c] sm:$0x1]  ;;  %vm3584_vm7 = vmand %vm231_vm2, %vm292_vm4 }
  0x23   : > { %v271_v19 = vld [vmem:[#allocation2 + $0x78] sm:$0x1]  ;;  %264 = vst [vmem:[#allocation2 + $0x54] sm:$0x1] %v263_v16  ;;  %267 = vst [vmem:[#allocation2 + $0x60] sm:$0x1] %v266_v17 }
  0x24   : > { %v269_v20 = vsel %vm3496_vm3, 0, %v268_v18  ;;  %v272_v21 = vsel %vm3496_vm3, 0, %v271_v19  ;;  %v274_v22 = vld [vmem:[#allocation2 + $0x84] sm:$0x1]  ;;  %v277_v23 = vld [vmem:[#allocation2 + $0x90] sm:$0x1] }
  0x25   : > { %270 = vst [vmem:[#allocation2 + $0x6c] sm:$0x1] %v269_v20  ;;  %273 = vst [vmem:[#allocation2 + $0x78] sm:$0x1] %v272_v21  ;;  %v275_v24 = vsel %vm3496_vm3, 0, %v274_v22  ;;  %v278_v25 = vsel %vm3496_vm3, 0, %v277_v23 }
  0x26   : > { %v280_v26 = vld [vmem:[#allocation2 + $0x9c] sm:$0x1]  ;;  %v283_v27 = vld [vmem:[#allocation2 + $0xa8] sm:$0x1]  ;;  %276 = vst [vmem:[#allocation2 + $0x84] sm:$0x1] %v275_v24 }
  0x27   : > { %279 = vst [vmem:[#allocation2 + $0x90] sm:$0x1] %v278_v25  ;;  %v281_v29 = vsel %vm3496_vm3, 0, %v280_v26  ;;  %v284_v30 = vsel %vm3496_vm3, 0, %v283_v27  ;;  %v286_v31 = vld [vmem:[#allocation2 + $0xb4] sm:$0x1] }
  0x28   : > { %v289_v32 = vld [vmem:[#allocation2 + $0xc0] sm:$0x1]  ;;  %282 = vst [vmem:[#allocation2 + $0x9c] sm:$0x1] %v281_v29  ;;  %285 = vst [vmem:[#allocation2 + $0xa8] sm:$0x1] %v284_v30 }
  0x29   : > { %v287_v33 = vsel %vm3496_vm3, 0, %v286_v31  ;;  %v290_v34 = vsel %vm3496_vm3, 0, %v289_v32  ;;  %v294_v35 = vld [vmem:[#allocation2 + $0x14] sm:$0x1]  ;;  %v297_v36 = vld [vmem:[#allocation2 + $0x20] sm:$0x1] }
  0x2a   : > { %288 = vst [vmem:[#allocation2 + $0xb4] sm:$0x1] %v287_v33  ;;  %291 = vst [vmem:[#allocation2 + $0xc0] sm:$0x1] %v290_v34  ;;  %v295_v37 = vsel %vm3532_vm5, 0, %v294_v35  ;;  %v298_v38 = vsel %vm3532_vm5, 0, %v297_v36 }
  0x2b   : > { %v300_v39 = vld [vmem:[#allocation2 + $0x2c] sm:$0x1]  ;;  %v303_v40 = vld [vmem:[#allocation2 + $0x38] sm:$0x1]  ;;  %296 = vst [vmem:[#allocation2 + $0x14] sm:$0x1] %v295_v37 }
  0x2c   : > { %299 = vst [vmem:[#allocation2 + $0x20] sm:$0x1] %v298_v38  ;;  %v301_v41 = vsel %vm3532_vm5, 0, %v300_v39  ;;  %v304_v42 = vsel %vm3532_vm5, 0, %v303_v40  ;;  %v306_v43 = vld [vmem:[#allocation2 + $0x44] sm:$0x1] }
  0x2d   : > { %v309_v44 = vld [vmem:[#allocation2 + $0x50] sm:$0x1]  ;;  %302 = vst [vmem:[#allocation2 + $0x2c] sm:$0x1] %v301_v41  ;;  %305 = vst [vmem:[#allocation2 + $0x38] sm:$0x1] %v304_v42 }
  0x2e   : > { %v307_v45 = vsel %vm3532_vm5, 0, %v306_v43  ;;  %v310_v46 = vsel %vm3532_vm5, 0, %v309_v44  ;;  %v312_v47 = vld [vmem:[#allocation2 + $0x5c] sm:$0x1]  ;;  %v315_v48 = vld [vmem:[#allocation2 + $0x68] sm:$0x1] }
  0x2f   : > { %308 = vst [vmem:[#allocation2 + $0x44] sm:$0x1] %v307_v45  ;;  %311 = vst [vmem:[#allocation2 + $0x50] sm:$0x1] %v310_v46  ;;  %v313_v49 = vsel %vm3532_vm5, 0, %v312_v47  ;;  %v316_v50 = vsel %vm3532_vm5, 0, %v315_v48 }
  0x30   : > { %v318_v51 = vld [vmem:[#allocation2 + $0x74] sm:$0x1]  ;;  %v321_v52 = vld [vmem:[#allocation2 + $0x80] sm:$0x1]  ;;  %314 = vst [vmem:[#allocation2 + $0x5c] sm:$0x1] %v313_v49 }
  0x31   : > { %317 = vst [vmem:[#allocation2 + $0x68] sm:$0x1] %v316_v50  ;;  %v319_v53 = vsel %vm3532_vm5, 0, %v318_v51  ;;  %v322_v54 = vsel %vm3532_vm5, 0, %v321_v52  ;;  %v324_v55 = vld [vmem:[#allocation2 + $0x8c] sm:$0x1] }
  0x32   : > { %v327_v56 = vld [vmem:[#allocation2 + $0x98] sm:$0x1]  ;;  %320 = vst [vmem:[#allocation2 + $0x74] sm:$0x1] %v319_v53  ;;  %323 = vst [vmem:[#allocation2 + $0x80] sm:$0x1] %v322_v54 }
  0x33   : > { %v325_v57 = vsel %vm3532_vm5, 0, %v324_v55  ;;  %v328_v58 = vsel %vm3532_vm5, 0, %v327_v56  ;;  %v330_v59 = vld [vmem:[#allocation2 + $0xa4] sm:$0x1]  ;;  %v333_v60 = vld [vmem:[#allocation2 + $0xb0] sm:$0x1] }
  0x34   : > { %326 = vst [vmem:[#allocation2 + $0x8c] sm:$0x1] %v325_v57  ;;  %329 = vst [vmem:[#allocation2 + $0x98] sm:$0x1] %v328_v58  ;;  %v331_v61 = vsel %vm3532_vm5, 0, %v330_v59  ;;  %v334_v62 = vsel %vm3532_vm5, 0, %v333_v60 }
  0x35   : > { %v336_v63 = vld [vmem:[#allocation2 + $0xbc] sm:$0x1]  ;;  %v339_v0 = vld [vmem:[#allocation2 + $0xc8] sm:$0x1]  ;;  %332 = vst [vmem:[#allocation2 + $0xa4] sm:$0x1] %v331_v61 }
  0x36   : > { %335 = vst [vmem:[#allocation2 + $0xb0] sm:$0x1] %v334_v62  ;;  %v337_v2 = vsel %vm3532_vm5, 0, %v336_v63  ;;  %v340_v3 = vsel %vm3532_vm5, 0, %v339_v0  ;;  %v342_v4 = vld [vmem:[%s3490_s10] sm:$0xff]  ;;  %v343_v5 = vld [vmem:[%s3490_s10 + $0x8] sm:$0xff] }
  0x37   : > { %338 = vst [vmem:[#allocation2 + $0xbc] sm:$0x1] %v337_v2  ;;  %341 = vst [vmem:[#allocation2 + $0xc8] sm:$0x1] %v340_v3  ;;  %v3101_v6 = vpack.c.bf16 %v342_v4, %v342_v4  ;;  %v3102_v7 = vpack.c.bf16 %v343_v5, %v343_v5  ;;  %v344_v8 = vld [vmem:[%s3490_s10 + $0x10] sm:$0xff]  ;;  %v345_v9 = vld [vmem:[%s3490_s10 + $0x18] sm:$0xff] }
  0x38   : > { %vm470_vm6 = vsmask.f32 4368  ;;  %v3103_v10 = vpack.c.bf16 %v344_v8, %v344_v8  ;;  %v3104_v11 = vpack.c.bf16 %v345_v9, %v345_v9  ;;  %v346_v16 = vld [vmem:[%s3490_s10 + $0x20] sm:$0xff]  ;;  %v347_v17 = vld [vmem:[%s3490_s10 + $0x28] sm:$0xff]  ;;  %v348_v27 = vld [vmem:[%s3490_s10 + $0x30] sm:$0xff] }
  0x39   : > { %v473_v12 = vshrl.u32 %v3101_v6, 16  ;;  %v476_v13 = vshll.u32 %v3101_v6, 16  ;;  %v481_v14 = vshrl.u32 %v3102_v7, 16  ;;  %v484_v15 = vshll.u32 %v3102_v7, 16  ;;  %v349_v28 = vld [vmem:[%s3490_s10 + $0x38] sm:$0xff]  ;;  %vm3592_vm8 = vmor %vm242_vm1, %vm470_vm6  ;;  %v350_v50 = vld [vmem:[%s3490_s10 + $0x40] sm:$0xff] }
  0x3a   : > { %v490_v18 = vshrl.u32 %v3103_v10, 16  ;;  %v493_v19 = vshll.u32 %v3103_v10, 16  ;;  %v498_v20 = vshrl.u32 %v3104_v11, 16  ;;  %v501_v21 = vshll.u32 %v3104_v11, 16  ;;  %v794_v29 = vld [vmem:[#allocation2 + $0xc] sm:$0xf] }
  0x3b   : > { %v475_v23 = vrot.slane %v473_v12, 7  ;;  %v483_v24 = vrot.slane %v481_v14, 7  ;;  %v3105_v25 = vpack.c.bf16 %v346_v16, %v346_v16  ;;  %v3106_v26 = vpack.c.bf16 %v347_v17, %v347_v17  ;;  %v798_v31 = vld [vmem:[#allocation2 + $0x14] sm:$0x1]  ;;  %v801_v40 = vld [vmem:[#allocation2 + $0x18] sm:$0xf] }
  0x3c   : > { %v492_v32 = vrot.slane %v490_v18, 7  ;;  %v500_v33 = vrot.slane %v498_v20, 7  ;;  %v3107_v34 = vpack.c.bf16 %v348_v27, %v348_v27  ;;  %v3108_v35 = vpack.c.bf16 %v349_v28, %v349_v28  ;;  %v805_v41 = vld [vmem:[#allocation2 + $0x20] sm:$0x1]  ;;  %v351_v59 = vld [vmem:[%s3490_s10 + $0x48] sm:$0xff] }
  0x3d   : > { %v478_v36 = vor.u32 %v476_v13, %v475_v23  ;;  %v479_v37 = vrot.slane %v475_v23, 4  ;;  %v486_v38 = vor.u32 %v484_v15, %v483_v24  ;;  %v488_v39 = vrot.slane %v483_v24, 4  ;;  %v808_v60 = vld [vmem:[#allocation2 + $0x24] sm:$0xf]  ;;  %v812_v5 = vld [vmem:[#allocation2 + $0x2c] sm:$0x1] }
  0x3e   : > { %v495_v42 = vor.u32 %v493_v19, %v492_v32  ;;  %v496_v43 = vrot.slane %v492_v32, 4  ;;  %v503_v44 = vor.u32 %v501_v21, %v500_v33  ;;  %v505_v45 = vrot.slane %v500_v33, 4  ;;  %v815_v7 = vld [vmem:[#allocation2 + $0x30] sm:$0xf]  ;;  %v819_v16 = vld [vmem:[#allocation2 + $0x38] sm:$0x1] }
  0x3f   : > { %v795_v46 = vsel %vm3584_vm7, %v478_v36, %v794_v29  ;;  %v487_v47 = vsel %vm3592_vm8, %v479_v37, %v486_v38  ;;  %v799_v48 = vsel %vm3496_vm3, %v488_v39, %v798_v31  ;;  %v507_v49 = vshrl.u32 %v3105_v25, 16  ;;  %v822_v17 = vld [vmem:[#allocation2 + $0x3c] sm:$0xf]  ;;  %v352_v23 = vld [vmem:[%s3490_s10 + $0x50] sm:$0xff]  ;;  %v354_v29 = vld [vmem:[%s3490_s10 + $0x60] sm:$0xff] }
  0x40   : > { %796 = vst [vmem:[#allocation2 + $0xc] sm:$0xf] %v795_v46  ;;  %797 = vst.msk [vmem:[#allocation2 + $0x10] sm:$0xf] %vm231_vm2, %v487_v47  ;;  %v802_v51 = vsel %vm3584_vm7, %v495_v42, %v801_v40  ;;  %v504_v52 = vsel %vm3592_vm8, %v496_v43, %v503_v44  ;;  %v806_v53 = vsel %vm3496_vm3, %v505_v45, %v805_v41  ;;  %v510_v54 = vshll.u32 %v3105_v25, 16  ;;  %v353_v24 = vld [vmem:[%s3490_s10 + $0x58] sm:$0xff] }
  0x41   : > { %800 = vst [vmem:[#allocation2 + $0x14] sm:$0x1] %v799_v48  ;;  %803 = vst [vmem:[#allocation2 + $0x18] sm:$0xf] %v802_v51  ;;  %v509_v55 = vrot.slane %v507_v49, 7  ;;  %v515_v56 = vshrl.u32 %v3106_v26, 16  ;;  %v3109_v0 = vpack.c.bf16 %v350_v50, %v350_v50  ;;  %v3110_v11 = vpack.c.bf16 %v351_v59, %v351_v59 }
  0x42   : > { %804 = vst.msk [vmem:[#allocation2 + $0x1c] sm:$0xf] %vm231_vm2, %v504_v52  ;;  %807 = vst [vmem:[#allocation2 + $0x20] sm:$0x1] %v806_v53  ;;  %v518_v57 = vshll.u32 %v3106_v26, 16  ;;  %v524_v58 = vshrl.u32 %v3107_v34, 16  ;;  %v3111_v39 = vpack.c.bf16 %v352_v23, %v352_v23  ;;  %v3112_v40 = vpack.c.bf16 %v353_v24, %v353_v24 }
  0x43   : > { %v527_v61 = vshll.u32 %v3107_v34, 16  ;;  %v532_v62 = vshrl.u32 %v3108_v35, 16  ;;  %v535_v63 = vshll.u32 %v3108_v35, 16  ;;  %v512_v2 = vor.u32 %v510_v54, %v509_v55  ;;  %v355_v31 = vld [vmem:[%s3490_s10 + $0x68] sm:$0xff]  ;;  %v356_v32 = vld [vmem:[%s3490_s10 + $0x70] sm:$0xff] }
  0x44   : > { %v513_v3 = vrot.slane %v509_v55, 4  ;;  %v517_v4 = vrot.slane %v515_v56, 7  ;;  %v526_v6 = vrot.slane %v524_v58, 7  ;;  %v541_v9 = vshrl.u32 %v3109_v0, 16  ;;  %v826_v42 = vld [vmem:[#allocation2 + $0x44] sm:$0x1] }
  0x45   : > { %v534_v8 = vrot.slane %v532_v62, 7  ;;  %v544_v10 = vshll.u32 %v3109_v0, 16  ;;  %v809_v12 = vsel %vm3584_vm7, %v512_v2, %v808_v60  ;;  %v549_v28 = vshrl.u32 %v3110_v11, 16  ;;  %v833_v60 = vld [vmem:[#allocation2 + $0x50] sm:$0x1] }
  0x46   : > { %v520_v13 = vor.u32 %v518_v57, %v517_v4  ;;  %v522_v14 = vrot.slane %v517_v4, 4  ;;  %v529_v15 = vor.u32 %v527_v61, %v526_v6  ;;  %810 = vst [vmem:[#allocation2 + $0x24] sm:$0xf] %v809_v12  ;;  %v530_v18 = vrot.slane %v526_v6, 4  ;;  %v829_v57 = vld [vmem:[#allocation2 + $0x48] sm:$0xf] }
  0x47   : > { %v537_v19 = vor.u32 %v535_v63, %v534_v8  ;;  %v539_v20 = vrot.slane %v534_v8, 4  ;;  %v543_v21 = vrot.slane %v541_v9, 7  ;;  %v551_v37 = vrot.slane %v549_v28, 7  ;;  %v357_v6 = vld [vmem:[%s3490_s10 + $0x78] sm:$0xff]  ;;  %v360_v24 = vld [vmem:[%s3490_s10 + $0x90] sm:$0xff] }
  0x48   : > { %v521_v25 = vsel %vm3592_vm8, %v513_v3, %v520_v13  ;;  %v813_v26 = vsel %vm3496_vm3, %v522_v14, %v812_v5  ;;  %v816_v27 = vsel %vm3584_vm7, %v529_v15, %v815_v7  ;;  %v552_v38 = vshll.u32 %v3110_v11, 16  ;;  %v836_v3 = vld [vmem:[#allocation2 + $0x54] sm:$0xf]  ;;  %v840_v11 = vld [vmem:[#allocation2 + $0x5c] sm:$0x1] }
  0x49   : > { %811 = vst.msk [vmem:[#allocation2 + $0x28] sm:$0xf] %vm231_vm2, %v521_v25  ;;  %814 = vst [vmem:[#allocation2 + $0x2c] sm:$0x1] %v813_v26  ;;  %v538_v33 = vsel %vm3592_vm8, %v530_v18, %v537_v19  ;;  %v820_v34 = vsel %vm3496_vm3, %v539_v20, %v819_v16  ;;  %v546_v35 = vor.u32 %v544_v10, %v543_v21  ;;  %v547_v36 = vrot.slane %v543_v21, 4  ;;  %v359_v18 = vld [vmem:[%s3490_s10 + $0x88] sm:$0xff] }
  0x4a   : > { %817 = vst [vmem:[#allocation2 + $0x30] sm:$0xf] %v816_v27  ;;  %818 = vst.msk [vmem:[#allocation2 + $0x34] sm:$0xf] %vm231_vm2, %v538_v33  ;;  %v3113_v43 = vpack.c.bf16 %v354_v29, %v354_v29  ;;  %v3114_v44 = vpack.c.bf16 %v355_v31, %v355_v31  ;;  %v3115_v45 = vpack.c.bf16 %v356_v32, %v356_v32  ;;  %v556_v47 = vrot.slane %v551_v37, 4  ;;  %v361_v25 = vld [vmem:[%s3490_s10 + $0x98] sm:$0xff] }
  0x4b   : > { %821 = vst [vmem:[#allocation2 + $0x38] sm:$0x1] %v820_v34  ;;  %v823_v41 = vsel %vm3584_vm7, %v546_v35, %v822_v17  ;;  %v554_v46 = vor.u32 %v552_v38, %v551_v37  ;;  %v558_v48 = vshrl.u32 %v3111_v39, 16  ;;  %v561_v49 = vshll.u32 %v3111_v39, 16  ;;  %v843_v16 = vld [vmem:[#allocation2 + $0x60] sm:$0xf] }
  0x4c   : > { %824 = vst [vmem:[#allocation2 + $0x3c] sm:$0xf] %v823_v41  ;;  %v566_v50 = vshrl.u32 %v3112_v40, 16  ;;  %v569_v51 = vshll.u32 %v3112_v40, 16  ;;  %v575_v52 = vshrl.u32 %v3113_v43, 16  ;;  %v578_v53 = vshll.u32 %v3113_v43, 16 }
  0x4d   : > { %v555_v54 = vsel %vm3592_vm8, %v547_v36, %v554_v46  ;;  %v827_v55 = vsel %vm3496_vm3, %v556_v47, %v826_v42  ;;  %v560_v56 = vrot.slane %v558_v48, 7  ;;  %v583_v58 = vshrl.u32 %v3114_v44, 16  ;;  %v358_v17 = vld [vmem:[%s3490_s10 + $0x80] sm:$0xff] }
  0x4e   : > { %825 = vst.msk [vmem:[#allocation2 + $0x40] sm:$0xf] %vm231_vm2, %v555_v54  ;;  %828 = vst [vmem:[#allocation2 + $0x44] sm:$0x1] %v827_v55  ;;  %v568_v59 = vrot.slane %v566_v50, 7  ;;  %v577_v61 = vrot.slane %v575_v52, 7  ;;  %v3116_v23 = vpack.c.bf16 %v357_v6, %v357_v6  ;;  %v3117_v34 = vpack.c.bf16 %v358_v17, %v358_v17 }
  0x4f   : > { %v586_v62 = vshll.u32 %v3114_v44, 16  ;;  %v592_v63 = vshrl.u32 %v3115_v45, 16  ;;  %v563_v0 = vor.u32 %v561_v49, %v560_v56  ;;  %v564_v2 = vrot.slane %v560_v56, 4  ;;  %v362_v26 = vld [vmem:[%s3490_s10 + $0xa0] sm:$0xff]  ;;  %v847_v44 = vld [vmem:[#allocation2 + $0x68] sm:$0x1] }
  0x50   : > { %v585_v4 = vrot.slane %v583_v58, 7  ;;  %v595_v5 = vshll.u32 %v3115_v45, 16  ;;  %v571_v7 = vor.u32 %v569_v51, %v568_v59  ;;  %v573_v8 = vrot.slane %v568_v59, 4  ;;  %v363_v6 = vld [vmem:[%s3490_s10 + $0xa8] sm:$0xff] }
  0x51   : > { %v580_v9 = vor.u32 %v578_v53, %v577_v61  ;;  %v581_v10 = vrot.slane %v577_v61, 4  ;;  %v830_v12 = vsel %vm3584_vm7, %v563_v0, %v829_v57  ;;  %v594_v15 = vrot.slane %v592_v63, 7  ;;  %v850_v53 = vld [vmem:[#allocation2 + $0x6c] sm:$0xf]  ;;  %v857_v63 = vld [vmem:[#allocation2 + $0x78] sm:$0xf] }
  0x52   : > { %v588_v13 = vor.u32 %v586_v62, %v585_v4  ;;  %v590_v14 = vrot.slane %v585_v4, 4  ;;  %831 = vst [vmem:[#allocation2 + $0x48] sm:$0xf] %v830_v12  ;;  %v572_v19 = vsel %vm3592_vm8, %v564_v2, %v571_v7  ;;  %v834_v20 = vsel %vm3496_vm3, %v573_v8, %v833_v60  ;;  %v854_v62 = vld [vmem:[#allocation2 + $0x74] sm:$0x1]  ;;  %v365_v12 = vld [vmem:[%s3490_s10 + $0xb8] sm:$0xff] }
  0x53   : > { %v837_v21 = vsel %vm3584_vm7, %v580_v9, %v836_v3  ;;  %832 = vst.msk [vmem:[#allocation2 + $0x4c] sm:$0xf] %vm231_vm2, %v572_v19  ;;  %835 = vst [vmem:[#allocation2 + $0x50] sm:$0x1] %v834_v20  ;;  %v597_v29 = vor.u32 %v595_v5, %v594_v15  ;;  %v598_v31 = vrot.slane %v594_v15, 4  ;;  %v600_v32 = vshrl.u32 %v3116_v23, 16 }
  0x54   : > { %838 = vst [vmem:[#allocation2 + $0x54] sm:$0xf] %v837_v21  ;;  %v589_v27 = vsel %vm3592_vm8, %v581_v10, %v588_v13  ;;  %v841_v28 = vsel %vm3496_vm3, %v590_v14, %v840_v11  ;;  %v603_v33 = vshll.u32 %v3116_v23, 16  ;;  %v3118_v35 = vpack.c.bf16 %v359_v18, %v359_v18  ;;  %v861_v5 = vld [vmem:[#allocation2 + $0x80] sm:$0x1]  ;;  %v364_v11 = vld [vmem:[%s3490_s10 + $0xb0] sm:$0xff] }
  0x55   : > { %839 = vst.msk [vmem:[#allocation2 + $0x58] sm:$0xf] %vm231_vm2, %v589_v27  ;;  %842 = vst [vmem:[#allocation2 + $0x5c] sm:$0x1] %v841_v28  ;;  %v844_v36 = vsel %vm3584_vm7, %v597_v29, %v843_v16  ;;  %v3119_v37 = vpack.c.bf16 %v360_v24, %v360_v24  ;;  %v3120_v38 = vpack.c.bf16 %v361_v25, %v361_v25  ;;  %v602_v40 = vrot.slane %v600_v32, 7  ;;  %v366_v13 = vld [vmem:[%s3490_s10 + $0xc0] sm:$0xff] }
  0x56   : > { %v3121_v39 = vpack.c.bf16 %v362_v26, %v362_v26  ;;  %845 = vst [vmem:[#allocation2 + $0x60] sm:$0xf] %v844_v36  ;;  %v609_v41 = vshrl.u32 %v3117_v34, 16  ;;  %v612_v42 = vshll.u32 %v3117_v34, 16  ;;  %v617_v43 = vshrl.u32 %v3118_v35, 16  ;;  %v367_v18 = vld [vmem:[%s3490_s10 + $0xc8] sm:$0xff] }
  0x57   : > { %v620_v45 = vshll.u32 %v3118_v35, 16  ;;  %v626_v46 = vshrl.u32 %v3119_v37, 16  ;;  %v629_v47 = vshll.u32 %v3119_v37, 16  ;;  %v634_v48 = vshrl.u32 %v3120_v38, 16  ;;  %v368_v19 = vld [vmem:[%s3490_s10 + $0xd0] sm:$0xff] }
  0x58   : > { %v605_v49 = vor.u32 %v603_v33, %v602_v40  ;;  %v607_v50 = vrot.slane %v602_v40, 4  ;;  %v611_v51 = vrot.slane %v609_v41, 7  ;;  %v619_v52 = vrot.slane %v617_v43, 7  ;;  %v864_v23 = vld [vmem:[#allocation2 + $0x84] sm:$0xf] }
  0x59   : > { %v628_v54 = vrot.slane %v626_v46, 7  ;;  %v636_v55 = vrot.slane %v634_v48, 7  ;;  %v637_v56 = vshll.u32 %v3120_v38, 16  ;;  %v643_v57 = vshrl.u32 %v3121_v39, 16  ;;  %v868_v40 = vld [vmem:[#allocation2 + $0x8c] sm:$0x1] }
  0x5a   : > { %v606_v58 = vsel %vm3592_vm8, %v598_v31, %v605_v49  ;;  %v848_v59 = vsel %vm3496_vm3, %v607_v50, %v847_v44  ;;  %v614_v60 = vor.u32 %v612_v42, %v611_v51  ;;  %v615_v61 = vrot.slane %v611_v51, 4  ;;  %v875_v51 = vld [vmem:[#allocation2 + $0x98] sm:$0x1] }
  0x5b   : > { %846 = vst.msk [vmem:[#allocation2 + $0x64] sm:$0xf] %vm231_vm2, %v606_v58  ;;  %849 = vst [vmem:[#allocation2 + $0x68] sm:$0x1] %v848_v59  ;;  %v622_v0 = vor.u32 %v620_v45, %v619_v52  ;;  %v624_v2 = vrot.slane %v619_v52, 4  ;;  %v631_v3 = vor.u32 %v629_v47, %v628_v54  ;;  %v632_v4 = vrot.slane %v628_v54, 4 }
  0x5c   : > { %v851_v7 = vsel %vm3584_vm7, %v614_v60, %v850_v53  ;;  %v639_v8 = vor.u32 %v637_v56, %v636_v55  ;;  %v641_v9 = vrot.slane %v636_v55, 4  ;;  %v645_v10 = vrot.slane %v643_v57, 7  ;;  %v871_v45 = vld [vmem:[#allocation2 + $0x90] sm:$0xf]  ;;  %v878_v58 = vld [vmem:[#allocation2 + $0x9c] sm:$0xf] }
  0x5d   : > { %852 = vst [vmem:[#allocation2 + $0x6c] sm:$0xf] %v851_v7  ;;  %v623_v14 = vsel %vm3592_vm8, %v615_v61, %v622_v0  ;;  %v855_v15 = vsel %vm3496_vm3, %v624_v2, %v854_v62  ;;  %v858_v16 = vsel %vm3584_vm7, %v631_v3, %v857_v63  ;;  %v646_v17 = vshll.u32 %v3121_v39, 16  ;;  %v369_v59 = vld [vmem:[%s3490_s10 + $0xd8] sm:$0xff]  ;;  %v370_v0 = vld [vmem:[%s3490_s10 + $0xe0] sm:$0xff]  ;;  %v371_v2 = vld [vmem:[%s3490_s10 + $0xe8] sm:$0xff] }
  0x5e   : > { %853 = vst.msk [vmem:[#allocation2 + $0x70] sm:$0xf] %vm231_vm2, %v623_v14  ;;  %856 = vst [vmem:[#allocation2 + $0x74] sm:$0x1] %v855_v15  ;;  %v640_v20 = vsel %vm3592_vm8, %v632_v4, %v639_v8  ;;  %v862_v21 = vsel %vm3496_vm3, %v641_v9, %v861_v5  ;;  %v3122_v24 = vpack.c.bf16 %v363_v6, %v363_v6  ;;  %v649_v25 = vrot.slane %v645_v10, 4 }
  0x5f   : > { %859 = vst [vmem:[#allocation2 + $0x78] sm:$0xf] %v858_v16  ;;  %860 = vst.msk [vmem:[#allocation2 + $0x7c] sm:$0xf] %vm231_vm2, %v640_v20  ;;  %v648_v26 = vor.u32 %v646_v17, %v645_v10  ;;  %v3123_v27 = vpack.c.bf16 %v364_v11, %v364_v11  ;;  %v3124_v28 = vpack.c.bf16 %v365_v12, %v365_v12  ;;  %v882_v8 = vld [vmem:[#allocation2 + $0xa4] sm:$0x1] }
  0x60   : > { %863 = vst [vmem:[#allocation2 + $0x80] sm:$0x1] %v862_v21  ;;  %v3125_v29 = vpack.c.bf16 %v366_v13, %v366_v13  ;;  %v651_v31 = vshrl.u32 %v3122_v24, 16  ;;  %v654_v32 = vshll.u32 %v3122_v24, 16  ;;  %v3126_v33 = vpack.c.bf16 %v367_v18, %v367_v18  ;;  %v885_v14 = vld [vmem:[#allocation2 + $0xa8] sm:$0xf] }
  0x61   : > { %v3127_v34 = vpack.c.bf16 %v368_v19, %v368_v19  ;;  %v865_v35 = vsel %vm3584_vm7, %v648_v26, %v864_v23  ;;  %v660_v36 = vshrl.u32 %v3123_v27, 16  ;;  %v663_v37 = vshll.u32 %v3123_v27, 16  ;;  %v372_v21 = vld [vmem:[%s3490_s10 + $0xf0] sm:$0xff]  ;;  %v373_v23 = vld [vmem:[%s3490_s10 + $0xf8] sm:$0xff] }
  0x62   : > { %v668_v38 = vshrl.u32 %v3124_v28, 16  ;;  %866 = vst [vmem:[#allocation2 + $0x84] sm:$0xf] %v865_v35  ;;  %v653_v39 = vrot.slane %v651_v31, 7  ;;  %v671_v41 = vshll.u32 %v3124_v28, 16  ;;  %v677_v42 = vshrl.u32 %v3125_v29, 16 }
  0x63   : > { %v680_v43 = vshll.u32 %v3125_v29, 16  ;;  %v662_v44 = vrot.slane %v660_v36, 7  ;;  %v685_v47 = vshrl.u32 %v3126_v33, 16  ;;  %v688_v48 = vshll.u32 %v3126_v33, 16  ;;  %v889_v33 = vld [vmem:[#allocation2 + $0xb0] sm:$0x1] }
  0x64   : > { %v670_v46 = vrot.slane %v668_v38, 7  ;;  %v656_v49 = vor.u32 %v654_v32, %v653_v39  ;;  %v658_v50 = vrot.slane %v653_v39, 4  ;;  %v679_v52 = vrot.slane %v677_v42, 7  ;;  %v892_v39 = vld [vmem:[#allocation2 + $0xb4] sm:$0xf] }
  0x65   : > { %v694_v53 = vshrl.u32 %v3127_v34, 16  ;;  %v665_v54 = vor.u32 %v663_v37, %v662_v44  ;;  %v666_v55 = vrot.slane %v662_v44, 4  ;;  %v687_v6 = vrot.slane %v685_v47, 7 }
  0x66   : > { %v673_v56 = vor.u32 %v671_v41, %v670_v46  ;;  %v675_v57 = vrot.slane %v670_v46, 4  ;;  %v657_v60 = vsel %vm3592_vm8, %v649_v25, %v656_v49  ;;  %v869_v61 = vsel %vm3496_vm3, %v658_v50, %v868_v40 }
  0x67   : > { %v682_v62 = vor.u32 %v680_v43, %v679_v52  ;;  %v683_v63 = vrot.slane %v679_v52, 4  ;;  %867 = vst.msk [vmem:[#allocation2 + $0x88] sm:$0xf] %vm231_vm2, %v657_v60  ;;  %870 = vst [vmem:[#allocation2 + $0x8c] sm:$0x1] %v869_v61  ;;  %v872_v3 = vsel %vm3584_vm7, %v665_v54, %v871_v45  ;;  %v696_v9 = vrot.slane %v694_v53, 7 }
  0x68   : > { %v674_v4 = vsel %vm3592_vm8, %v666_v55, %v673_v56  ;;  %v876_v5 = vsel %vm3496_vm3, %v675_v57, %v875_v51  ;;  %873 = vst [vmem:[#allocation2 + $0x90] sm:$0xf] %v872_v3  ;;  %v697_v10 = vshll.u32 %v3127_v34, 16  ;;  %v3128_v11 = vpack.c.bf16 %v369_v59, %v369_v59  ;;  %v896_v43 = vld [vmem:[#allocation2 + $0xbc] sm:$0x1] }
  0x69   : > { %874 = vst.msk [vmem:[#allocation2 + $0x94] sm:$0xf] %vm231_vm2, %v674_v4  ;;  %877 = vst [vmem:[#allocation2 + $0x98] sm:$0x1] %v876_v5  ;;  %v879_v7 = vsel %vm3584_vm7, %v682_v62, %v878_v58  ;;  %v690_v12 = vor.u32 %v688_v48, %v687_v6  ;;  %v692_v13 = vrot.slane %v687_v6, 4  ;;  %v3129_v15 = vpack.c.bf16 %v370_v0, %v370_v0 }
  0x6a   : > { %880 = vst [vmem:[#allocation2 + $0x9c] sm:$0xf] %v879_v7  ;;  %v3130_v16 = vpack.c.bf16 %v371_v2, %v371_v2  ;;  %v699_v17 = vor.u32 %v697_v10, %v696_v9  ;;  %v700_v18 = vrot.slane %v696_v9, 4  ;;  %v702_v19 = vshrl.u32 %v3128_v11, 16  ;;  %v899_v56 = vld [vmem:[#allocation2 + $0xc0] sm:$0xf] }
  0x6b   : > { %v705_v20 = vshll.u32 %v3128_v11, 16  ;;  %v691_v24 = vsel %vm3592_vm8, %v683_v63, %v690_v12  ;;  %v883_v25 = vsel %vm3496_vm3, %v692_v13, %v882_v8  ;;  %v711_v26 = vshrl.u32 %v3129_v15, 16  ;;  %v903_v60 = vld [vmem:[#allocation2 + $0xc8] sm:$0x1] }
  0x6c   : > { %v714_v27 = vshll.u32 %v3129_v15, 16  ;;  %881 = vst.msk [vmem:[#allocation2 + $0xa0] sm:$0xf] %vm231_vm2, %v691_v24  ;;  %884 = vst [vmem:[#allocation2 + $0xa4] sm:$0x1] %v883_v25  ;;  %v886_v28 = vsel %vm3584_vm7, %v699_v17, %v885_v14  ;;  %v704_v29 = vrot.slane %v702_v19, 7  ;;  %v3131_v35 = vpack.c.bf16 %v372_v21, %v372_v21 }
  0x6d   : > { %v719_v31 = vshrl.u32 %v3130_v16, 16  ;;  %v722_v32 = vshll.u32 %v3130_v16, 16  ;;  %887 = vst [vmem:[#allocation2 + $0xa8] sm:$0xf] %v886_v28  ;;  %v713_v34 = vrot.slane %v711_v26, 7  ;;  %v3132_v36 = vpack.c.bf16 %v373_v23, %v373_v23 }
  0x6e   : > { %v707_v37 = vor.u32 %v705_v20, %v704_v29  ;;  %v709_v38 = vrot.slane %v704_v29, 4  ;;  %v728_v44 = vshrl.u32 %v3131_v35, 16  ;;  %v731_v45 = vshll.u32 %v3131_v35, 16 }
  0x6f   : > { %v721_v40 = vrot.slane %v719_v31, 7  ;;  %v716_v41 = vor.u32 %v714_v27, %v713_v34  ;;  %v717_v42 = vrot.slane %v713_v34, 4  ;;  %v736_v52 = vshrl.u32 %v3132_v36, 16 }
  0x70   : > { %v708_v46 = vsel %vm3592_vm8, %v700_v18, %v707_v37  ;;  %v890_v47 = vsel %vm3496_vm3, %v709_v38, %v889_v33  ;;  %v730_v51 = vrot.slane %v728_v44, 7  ;;  %v739_v53 = vshll.u32 %v3132_v36, 16 }
  0x71   : > { %v724_v48 = vor.u32 %v722_v32, %v721_v40  ;;  %v726_v49 = vrot.slane %v721_v40, 4  ;;  %888 = vst.msk [vmem:[#allocation2 + $0xac] sm:$0xf] %vm231_vm2, %v708_v46  ;;  %891 = vst [vmem:[#allocation2 + $0xb0] sm:$0x1] %v890_v47  ;;  %v893_v50 = vsel %vm3584_vm7, %v716_v41, %v892_v39  ;;  %v738_v59 = vrot.slane %v736_v52, 7 }
  0x72   : > { %894 = vst [vmem:[#allocation2 + $0xb4] sm:$0xf] %v893_v50  ;;  %v733_v57 = vor.u32 %v731_v45, %v730_v51  ;;  %v734_v58 = vrot.slane %v730_v51, 4 }
  0x73   : > { %v725_v54 = vsel %vm3592_vm8, %v717_v42, %v724_v48  ;;  %v897_v55 = vsel %vm3496_vm3, %v726_v49, %v896_v43  ;;  %v741_v62 = vor.u32 %v739_v53, %v738_v59  ;;  %v743_v63 = vrot.slane %v738_v59, 4 }
  0x74   : > { %895 = vst.msk [vmem:[#allocation2 + $0xb8] sm:$0xf] %vm231_vm2, %v725_v54  ;;  %898 = vst [vmem:[#allocation2 + $0xbc] sm:$0x1] %v897_v55  ;;  %v900_v61 = vsel %vm3584_vm7, %v733_v57, %v899_v56 }
  0x75   : > { %901 = vst [vmem:[#allocation2 + $0xc0] sm:$0xf] %v900_v61  ;;  %v742_v0 = vsel %vm3592_vm8, %v734_v58, %v741_v62  ;;  %v904_v2 = vsel %vm3496_vm3, %v743_v63, %v903_v60 }
  0x76   : > { %902 = vst.msk [vmem:[#allocation2 + $0xc4] sm:$0xf] %vm231_vm2, %v742_v0  ;;  %905 = vst [vmem:[#allocation2 + $0xc8] sm:$0x1] %v904_v2 }
  0x77 PF: > { %s3133_s20 = smul.u32 96, %s3361_s15  ;;  %vm1310_vm9 = vcmask 1042432   ;;  %vm1311_vm10 = vcmask 1046532   ;;  %vm1010_vm12 = vsmask.f32 3328  ;;  %s3380_s24 = smov 8  }
  0x78   : > { %vm3733_vm11 = vmor %vm1310_vm9, %vm1311_vm10  ;;  %vm1011_vm13 = vsmask.f32 7440  ;;  %s3381_s27 = smov 4   ;;  %s3382_s28 = smov 12   ;;  %vm977_vm15 = vcmask 31744   ;;  %vm1253_vm0 = vcmask 64544  }
  0x79   : > { %s3737_s21 = scalar_lea.vmem [#allocation2], %s3133_s20  ;;  %vm3781_vm14 = vmor %vm1010_vm12, %vm1011_vm13  ;;  %s3383_s29 = smov 16   ;;  %vm1417_vm1 = vcmask 97344   ;;  %vm1510_vm2 = vcmask 130144   ;;  %vm2540_vm3 = vcmask 1041408   ;;  %vm1783_vm4 = vcmask 162944  }
  0x7a   : > { %s3384_s5 = smov 20   ;;  %s3385_s6 = smov 24   ;;  %vm1944_vm5 = vcmask 195744   ;;  %vm2037_vm6 = vcmask 228544   ;;  %vm2310_vm7 = vcmask 261344   ;;  %vm2471_vm8 = vcmask 294144  }
  0x7b   : > { %s3386_s7 = smov 28   ;;  %s3387_s10 = smov 32   ;;  %vm2515_vm9 = vcmask 293888  }
  0x7c   : > { %s4311_s8 = scalar_lea.sflag [#allocation5], %s208_s4 }
  0x7d   : > { %v1274_v1 = vld [vmem:[%s3737_s21 + $0x30] sm:$0xe]  ;;  %v1275_v30 = vld [vmem:[%s3737_s21 + $0x34] sm:$0xf]  ;;  %v1276_v3 = vld [vmem:[%s3737_s21 + $0x38] sm:$0x1] }
  0x7e   : > { %v2873_v4 = vrot.slane %v1274_v1, 9  ;;  %v1343_v5 = vrot.slane %v1275_v30, 5  ;;  %v1346_v6 = vrot.slane %v1276_v3, 5  ;;  %v1262_v7 = vld [vmem:[%s3737_s21] sm:$0xe] }
  0x7f   : > { %v1263_v8 = vld [vmem:[%s3737_s21 + $0x4] sm:$0xf]  ;;  %v1264_v9 = vld [vmem:[%s3737_s21 + $0x8] sm:$0x1]  ;;  %v2869_v10 = vrot.slane %v1262_v7, 9 }
  0x80   : > { %v1344_v11 = vsel %vm3733_vm11, %v2873_v4, %v1343_v5  ;;  %v1345_v12 = vrot.slane %v1343_v5, 4  ;;  %v1315_v13 = vrot.slane %v1263_v8, 5  ;;  %v1318_v14 = vrot.slane %v1264_v9, 5  ;;  %v1277_v15 = vld [vmem:[%s3737_s21 + $0x3c] sm:$0xe] }
  0x81   : > { %v1278_v16 = vld [vmem:[%s3737_s21 + $0x40] sm:$0xf]  ;;  %v1279_v17 = vld [vmem:[%s3737_s21 + $0x44] sm:$0x1]  ;;  %v2874_v18 = vrot.slane %v1277_v15, 9 }
  0x82   : > { %v1347_v19 = vsel %vm3733_vm11, %v1345_v12, %v1346_v6  ;;  %v1316_v20 = vsel %vm3733_vm11, %v2869_v10, %v1315_v13  ;;  %v1317_v21 = vrot.slane %v1315_v13, 4  ;;  %v1350_v23 = vrot.slane %v1278_v16, 5  ;;  %v1265_v24 = vld [vmem:[%s3737_s21 + $0xc] sm:$0xe]  ;;  %v1266_v25 = vld [vmem:[%s3737_s21 + $0x10] sm:$0xf] }
  0x83   : > { %v2881_v26 = vcombine.low %v1344_v11, %v1347_v19  ;;  %v1353_v27 = vrot.slane %v1279_v17, 5  ;;  %v1267_v28 = vld [vmem:[%s3737_s21 + $0x14] sm:$0x1]  ;;  %v2870_v29 = vrot.slane %v1265_v24, 9  ;;  %v1322_v31 = vrot.slane %v1266_v25, 5 }
  0x84   : > { %v1319_v32 = vsel %vm3733_vm11, %v1317_v21, %v1318_v14  ;;  %v1351_v33 = vsel %vm3733_vm11, %v2874_v18, %v1350_v23  ;;  %v1352_v34 = vrot.slane %v1350_v23, 4  ;;  %v1325_v35 = vrot.slane %v1267_v28, 5  ;;  %v989_v36 = vld [vmem:[%s3737_s21 + $0xc] sm:$0xf]  ;;  %v990_v37 = vld [vmem:[%s3737_s21 + $0x10] sm:$0xf] }
  0x85   : > { %1401 = vrot.lane.b32.xlu1 %v2881_v26, %s3380_s24  ;;  %v2877_v38 = vcombine.low %v1316_v20, %v1319_v32  ;;  %v1323_v39 = vsel %vm3733_vm11, %v2870_v29, %v1322_v31  ;;  %v1324_v40 = vrot.slane %v1322_v31, 4  ;;  %v991_v41 = vld [vmem:[%s3737_s21 + $0x14] sm:$0x1]  ;;  %v1038_v42 = vshrl.u32 %v989_v36, 16  ;;  %v986_v43 = vld [vmem:[%s3737_s21] sm:$0xf] }
  0x86   : > { %v1354_v44 = vsel %vm3733_vm11, %v1352_v34, %v1353_v27  ;;  %v1041_v45 = vshll.u32 %v989_v36, 16  ;;  %v1047_v46 = vshll.u32 %v990_v37, 16  ;;  %v1051_v47 = vshrl.u32 %v990_v37, 16  ;;  %v987_v48 = vld [vmem:[%s3737_s21 + $0x4] sm:$0xf] }
  0x87   : > { %1393 = vrot.lane.b32.xlu0 %v2877_v38, %s3380_s24  ;;  %v2882_v49 = vcombine.low %v1351_v33, %v1354_v44  ;;  %v1326_v50 = vsel %vm3733_vm11, %v1324_v40, %v1325_v35  ;;  %v1040_v51 = vrot.slane %v1038_v42, 4  ;;  %v1057_v52 = vshll.u32 %v991_v41, 16  ;;  %v988_v53 = vld [vmem:[%s3737_s21 + $0x8] sm:$0x1]  ;;  %v1001_v58 = vld [vmem:[%s3737_s21 + $0x3c] sm:$0xf] }
  0x88   : > { %v2878_v54 = vcombine.low %v1323_v39, %v1326_v50  ;;  %v1043_v55 = vrot.slane %v1041_v45, 5  ;;  %v1049_v56 = vrot.slane %v1047_v46, 5  ;;  %v1053_v57 = vrot.slane %v1051_v47, 4  ;;  %v1002_v30 = vld [vmem:[%s3737_s21 + $0x40] sm:$0xf] }
  0x89   : > { %1403 = vrot.lane.b32.xlu1 %v2882_v49, %s3380_s24  ;;  %v1059_v59 = vrot.slane %v1057_v52, 5  ;;  %v1014_v60 = vshrl.u32 %v986_v43, 16  ;;  %v1017_v61 = vshll.u32 %v986_v43, 16  ;;  %v1023_v62 = vshll.u32 %v987_v48, 16  ;;  %v1003_v7 = vld [vmem:[%s3737_s21 + $0x44] sm:$0x1] }
  0x8a   : > { %v1044_v63 = vor.u32 %v1043_v55, %v1040_v51  ;;  %v1054_v0 = vor.u32 %v1053_v57, %v1049_v56  ;;  %v1027_v2 = vshrl.u32 %v987_v48, 16  ;;  %v1033_v1 = vshll.u32 %v988_v53, 16  ;;  %v998_v9 = vld [vmem:[%s3737_s21 + $0x30] sm:$0xf]  ;;  %v999_v14 = vld [vmem:[%s3737_s21 + $0x34] sm:$0xf] }
  0x8b   : > { %1395 = vrot.lane.b32.xlu0 %v2878_v54, %s3380_s24  ;;  %v1016_v4 = vrot.slane %v1014_v60, 4  ;;  %v1019_v5 = vrot.slane %v1017_v61, 5  ;;  %v1025_v6 = vrot.slane %v1023_v62, 5  ;;  %v1134_v8 = vshrl.u32 %v1001_v58, 16  ;;  %v1000_v28 = vld [vmem:[%s3737_s21 + $0x38] sm:$0x1] }
  0x8c   : > { %v1045_v10 = vrot.slane %v1044_v63, 4  ;;  %v1055_v11 = vrot.slane %v1054_v0, 4  ;;  %v1029_v12 = vrot.slane %v1027_v2, 4  ;;  %v1035_v13 = vrot.slane %v1033_v1, 5  ;;  %v2923_v42 = vld [vmem:[%s3737_s21 + $0x3c] sm:$0xf] }
  0x8d   : > { %v1020_v15 = vor.u32 %v1019_v5, %v1016_v4  ;;  %v1136_v16 = vrot.slane %v1134_v8, 4  ;;  %v1137_v17 = vshll.u32 %v1001_v58, 16  ;;  %v1143_v18 = vshll.u32 %v1002_v30, 16  ;;  %v2924_v43 = vld [vmem:[%s3737_s21 + $0x40] sm:$0xf] }
  0x8e   : > { %v1050_v19 = vsel %vm3781_vm14, %v1045_v10, %v1049_v56  ;;  %v1060_v20 = vsel %vm3781_vm14, %v1055_v11, %v1059_v59  ;;  %v1030_v21 = vor.u32 %v1029_v12, %v1025_v6  ;;  %v1147_v23 = vshrl.u32 %v1002_v30, 16  ;;  %v2925_v54 = vld [vmem:[%s3737_s21 + $0x44] sm:$0x1]  ;;  %v2911_v57 = vld [vmem:[%s3737_s21 + $0xc] sm:$0xf]  ;;  %v3256_v4 = vld [vmem:[%s3737_s21 + $0x3c] sm:$0xff]  }
  0x8f   : > { %v2862_v24 = vcombine.low %v1050_v19, %v1060_v20  ;;  %v1021_v25 = vrot.slane %v1020_v15, 4  ;;  %v1139_v26 = vrot.slane %v1137_v17, 5  ;;  %v1145_v27 = vrot.slane %v1143_v18, 5  ;;  %v2912_v62 = vld [vmem:[%s3737_s21 + $0x10] sm:$0xf] }
  0x90   : > { %v1031_v29 = vrot.slane %v1030_v21, 4  ;;  %v1149_v31 = vrot.slane %v1147_v23, 4  ;;  %v1153_v32 = vshll.u32 %v1003_v7, 16  ;;  %v1110_v33 = vshrl.u32 %v998_v9, 16  ;;  %v2913_v10 = vld [vmem:[%s3737_s21 + $0x14] sm:$0x1] }
  0x91   : > { %1231 = vrot.lane.b32.xlu1 %v2862_v24, %s3381_s27  ;;  %v1026_v34 = vsel %vm3781_vm14, %v1021_v25, %v1025_v6  ;;  %v1140_v35 = vor.u32 %v1139_v26, %v1136_v16  ;;  %v1113_v36 = vshll.u32 %v998_v9, 16  ;;  %v1119_v37 = vshll.u32 %v999_v14, 16  ;;  %v2927_v26 = vld [vmem:[%s3737_s21 + $0x4c] sm:$0xf] }
  0x92   : > { %v1036_v38 = vsel %vm3781_vm14, %v1031_v29, %v1035_v13  ;;  %v1150_v39 = vor.u32 %v1149_v31, %v1145_v27  ;;  %v1155_v40 = vrot.slane %v1153_v32, 5  ;;  %v1112_v41 = vrot.slane %v1110_v33, 4  ;;  %v2926_v13 = vld [vmem:[%s3737_s21 + $0x48] sm:$0xf] }
  0x93   : > { %v2861_v44 = vcombine.low %v1026_v34, %v1036_v38  ;;  %v1141_v45 = vrot.slane %v1140_v35, 4  ;;  %v1115_v46 = vrot.slane %v1113_v36, 5  ;;  %v1121_v47 = vrot.slane %v1119_v37, 5  ;;  %v3258_v29 = vld [vmem:[%s3737_s21 + $0x48] sm:$0xff]   ;;  %v2928_v34 = vld [vmem:[%s3737_s21 + $0x50] sm:$0x1] }
  0x94   : > { %v1151_v48 = vrot.slane %v1150_v39, 4  ;;  %v1123_v49 = vshrl.u32 %v999_v14, 16  ;;  %v1129_v50 = vshll.u32 %v1000_v28, 16  ;;  %v1640_v51 = vshrl.u32 %v2923_v42, 16  ;;  %v2914_v35 = vld [vmem:[%s3737_s21 + $0x18] sm:$0xf] }
  0x95   : > { %1229 = vrot.lane.b32.xlu0 %v2861_v44, %s3381_s27  ;;  %v1146_v52 = vsel %vm3781_vm14, %v1141_v45, %v1145_v27  ;;  %v1116_v53 = vor.u32 %v1115_v46, %v1112_v41  ;;  %v1643_v55 = vshll.u32 %v2923_v42, 16  ;;  %v1649_v56 = vshll.u32 %v2924_v43, 16  ;;  %v2915_v45 = vld [vmem:[%s3737_s21 + $0x1c] sm:$0xf] }
  0x96   : > { %v1156_v58 = vsel %vm3781_vm14, %v1151_v48, %v1155_v40  ;;  %v1125_v59 = vrot.slane %v1123_v49, 4  ;;  %v1131_v60 = vrot.slane %v1129_v50, 5  ;;  %v1642_v61 = vrot.slane %v1640_v51, 4  ;;  %v3257_v40 = vld [vmem:[%s3737_s21 + $0xc] sm:$0xff]   ;;  %v2916_v49 = vld [vmem:[%s3737_s21 + $0x20] sm:$0x1] }
  0x97   : > { %v2866_v63 = vcombine.low %v1146_v52, %v1156_v58  ;;  %v1117_v0 = vrot.slane %v1116_v53, 4  ;;  %v1645_v2 = vrot.slane %v1643_v55, 5  ;;  %v1651_v1 = vrot.slane %v1649_v56, 5  ;;  %v2955_v55 = vld [vmem:[%s3737_s21 + $0x3c] sm:$0xe] }
  0x98   : > { %v1126_v30 = vor.u32 %v1125_v59, %v1121_v47  ;;  %v1653_v5 = vshrl.u32 %v2924_v43, 16  ;;  %v1659_v6 = vshll.u32 %v2925_v54, 16  ;;  %v1544_v7 = vshrl.u32 %v2911_v57, 16  ;;  %v2956_v56 = vld [vmem:[%s3737_s21 + $0x40] sm:$0xf] }
  0x99   : > { %1239 = vrot.lane.b32.xlu1 %v2866_v63, %s3381_s27  ;;  %v1122_v8 = vsel %vm3781_vm14, %v1117_v0, %v1121_v47  ;;  %v1646_v9 = vor.u32 %v1645_v2, %v1642_v61  ;;  %v1547_v11 = vshll.u32 %v2911_v57, 16  ;;  %v1553_v12 = vshll.u32 %v2912_v62, 16  ;;  %v2957_v61 = vld [vmem:[%s3737_s21 + $0x44] sm:$0x1]  ;;  %v3259_v63 = vld [vmem:[%s3737_s21 + $0x18] sm:$0xff]  }
  0x9a   : > { %v1127_v14 = vrot.slane %v1126_v30, 4  ;;  %v1655_v15 = vrot.slane %v1653_v5, 4  ;;  %v1661_v16 = vrot.slane %v1659_v6, 5  ;;  %v1546_v17 = vrot.slane %v1544_v7, 4 }
  0x9b   : > { %v1647_v18 = vrot.slane %v1646_v9, 4  ;;  %v1549_v19 = vrot.slane %v1547_v11, 5  ;;  %v1555_v20 = vrot.slane %v1553_v12, 5  ;;  %v1557_v21 = vshrl.u32 %v2912_v62, 16  ;;  %v2943_v62 = vld [vmem:[%s3737_s21 + $0xc] sm:$0xe] }
  0x9c   : > { %v1132_v23 = vsel %vm3781_vm14, %v1127_v14, %v1131_v60  ;;  %v1656_v24 = vor.u32 %v1655_v15, %v1651_v1  ;;  %v1563_v25 = vshll.u32 %v2913_v10, 16  ;;  %v1664_v27 = vshrl.u32 %v2926_v13, 16  ;;  %v2945_v9 = vld [vmem:[%s3737_s21 + $0x14] sm:$0x1]  ;;  %v2958_v14 = vld [vmem:[%s3737_s21 + $0x48] sm:$0xe] }
  0x9d   : > { %v2865_v28 = vcombine.low %v1122_v8, %v1132_v23  ;;  %1494 = vrot.lane.b32.xlu1 %v3256_v4, %s3382_s28  ;;  %v1652_v31 = vsel %vm3781_vm14, %v1647_v18, %v1651_v1  ;;  %v1550_v32 = vor.u32 %v1549_v19, %v1546_v17  ;;  %v1559_v33 = vrot.slane %v1557_v21, 4  ;;  %v2944_v4 = vld [vmem:[%s3737_s21 + $0x10] sm:$0xf]  ;;  %v2959_v19 = vld [vmem:[%s3737_s21 + $0x4c] sm:$0xf] }
  0x9e   : > { %v1657_v36 = vrot.slane %v1656_v24, 4  ;;  %v1565_v37 = vrot.slane %v1563_v25, 5  ;;  %v1666_v38 = vrot.slane %v1664_v27, 4  ;;  %v1667_v39 = vshll.u32 %v2926_v13, 16  ;;  %v2960_v25 = vld [vmem:[%s3737_s21 + $0x50] sm:$0x1] }
  0x9f   : > { %1237 = vrot.lane.b32.xlu0 %v2865_v28, %s3381_s27  ;;  %v1551_v41 = vrot.slane %v1550_v32, 4  ;;  %v1560_v42 = vor.u32 %v1559_v33, %v1555_v20  ;;  %v1673_v43 = vshll.u32 %v2927_v26, 16  ;;  %v1677_v44 = vshrl.u32 %v2927_v26, 16 }
  0xa0   : > { %v1662_v46 = vsel %vm3781_vm14, %v1657_v36, %v1661_v16  ;;  %v1669_v47 = vrot.slane %v1667_v39, 5  ;;  %v1683_v48 = vshll.u32 %v2928_v34, 16  ;;  %v1568_v50 = vshrl.u32 %v2914_v35, 16 }
  0xa1   : > { %1496 = vrot.lane.b32.xlu1 %v3258_v29, %s3382_s28  ;;  %v2939_v51 = vcombine.low %v1652_v31, %v1662_v46  ;;  %v1556_v52 = vsel %vm3781_vm14, %v1551_v41, %v1555_v20  ;;  %v1561_v53 = vrot.slane %v1560_v42, 4  ;;  %v1675_v54 = vrot.slane %v1673_v43, 5  ;;  %v2948_v41 = vld [vmem:[%s3737_s21 + $0x20] sm:$0x1]  ;;  %v3021_v46 = vld [vmem:[%s3737_s21 + $0x48] sm:$0xf] }
  0xa2   : > { %v1670_v57 = vor.u32 %v1669_v47, %v1666_v38  ;;  %v1679_v58 = vrot.slane %v1677_v44, 4  ;;  %v1685_v59 = vrot.slane %v1683_v48, 5  ;;  %v1570_v60 = vrot.slane %v1568_v50, 4  ;;  %v3022_v47 = vld [vmem:[%s3737_s21 + $0x4c] sm:$0xf] }
  0xa3   : > { %1486 = vrot.lane.b32.xlu0 %v3257_v40, %s3382_s28  ;;  %v1566_v0 = vsel %vm3781_vm14, %v1561_v53, %v1565_v37  ;;  %v1571_v2 = vshll.u32 %v2914_v35, 16  ;;  %v1577_v1 = vshll.u32 %v2915_v45, 16  ;;  %v1581_v30 = vshrl.u32 %v2915_v45, 16  ;;  %v2946_v35 = vld [vmem:[%s3737_s21 + $0x18] sm:$0xe] }
  0xa4   : > { %v2935_v5 = vcombine.low %v1556_v52, %v1566_v0  ;;  %v1671_v6 = vrot.slane %v1670_v57, 4  ;;  %v1680_v7 = vor.u32 %v1679_v58, %v1675_v54  ;;  %v1587_v8 = vshll.u32 %v2916_v49, 16  ;;  %v2947_v40 = vld [vmem:[%s3737_s21 + $0x1c] sm:$0xf] }
  0xa5   : > { %1767 = vrot.lane.b32.xlu1 %v2939_v51, %s3383_s29  ;;  %v1573_v10 = vrot.slane %v1571_v2, 5  ;;  %v1579_v11 = vrot.slane %v1577_v1, 5  ;;  %v1583_v12 = vrot.slane %v1581_v30, 4  ;;  %v2971_v13 = vrot.slane %v2955_v55, 9  ;;  %v3010_v1 = vld [vmem:[%s3737_s21 + $0x1c] sm:$0xf] }
  0xa6   : > { %v1676_v15 = vsel %vm3781_vm14, %v1671_v6, %v1675_v54  ;;  %v1681_v16 = vrot.slane %v1680_v7, 4  ;;  %v1589_v17 = vrot.slane %v1587_v8, 5  ;;  %v1870_v18 = vrot.slane %v2956_v56, 5  ;;  %v3023_v56 = vld [vmem:[%s3737_s21 + $0x50] sm:$0x1] }
  0xa7   : > { %1488 = vrot.lane.b32.xlu0 %v3259_v63, %s3382_s28  ;;  %v1574_v20 = vor.u32 %v1573_v10, %v1570_v60  ;;  %v1584_v21 = vor.u32 %v1583_v12, %v1579_v11  ;;  %v1873_v23 = vrot.slane %v2957_v61, 5  ;;  %v2967_v24 = vrot.slane %v2943_v62, 9  ;;  %v3009_v61 = vld [vmem:[%s3737_s21 + $0x18] sm:$0xf]  ;;  %v3011_v10 = vld [vmem:[%s3737_s21 + $0x20] sm:$0x1] }
  0xa8   : > { %v1686_v26 = vsel %vm3781_vm14, %v1681_v16, %v1685_v59  ;;  %v1871_v27 = vsel %vm3733_vm11, %v2971_v13, %v1870_v18  ;;  %v1872_v28 = vrot.slane %v1870_v18, 4  ;;  %v1842_v29 = vrot.slane %v2944_v4, 5  ;;  %v3024_v16 = vld [vmem:[%s3737_s21 + $0x54] sm:$0xf] }
  0xa9   : > { %v2940_v31 = vcombine.low %v1676_v15, %v1686_v26  ;;  %v1575_v32 = vrot.slane %v1574_v20, 4  ;;  %v1585_v33 = vrot.slane %v1584_v21, 4  ;;  %v1845_v34 = vrot.slane %v2945_v9, 5 }
  0xaa   : > { %v1874_v36 = vsel %vm3733_vm11, %v1872_v28, %v1873_v23  ;;  %v1843_v37 = vsel %vm3733_vm11, %v2967_v24, %v1842_v29  ;;  %v1844_v38 = vrot.slane %v1842_v29, 4  ;;  %v2972_v39 = vrot.slane %v2958_v14, 9  ;;  %v3025_v23 = vld [vmem:[%s3737_s21 + $0x58] sm:$0xf] }
  0xab   : > { %1759 = vrot.lane.b32.xlu0 %v2935_v5, %s3383_s29  ;;  %1769 = vrot.lane.b32.xlu1 %v2940_v31, %s3383_s29  ;;  %v1580_v42 = vsel %vm3781_vm14, %v1575_v32, %v1579_v11  ;;  %v1590_v43 = vsel %vm3781_vm14, %v1585_v33, %v1589_v17  ;;  %v2979_v44 = vcombine.low %v1871_v27, %v1874_v36  ;;  %v1877_v45 = vrot.slane %v2959_v19, 5  ;;  %v3260_v17 = vld [vmem:[%s3737_s21 + $0x48] sm:$0xff]   ;;  %v3261_v28 = vld [vmem:[%s3737_s21 + $0x18] sm:$0xff]  }
  0xac   : > { %v2936_v48 = vcombine.low %v1580_v42, %v1590_v43  ;;  %v1846_v49 = vsel %vm3733_vm11, %v1844_v38, %v1845_v34  ;;  %v1880_v50 = vrot.slane %v2960_v25, 5  ;;  %v2968_v51 = vrot.slane %v2946_v35, 9 }
  0xad   : > { %v2975_v52 = vcombine.low %v1843_v37, %v1846_v49  ;;  %v1878_v53 = vsel %vm3733_vm11, %v2972_v39, %v1877_v45  ;;  %v1879_v54 = vrot.slane %v1877_v45, 4  ;;  %v1849_v55 = vrot.slane %v2947_v40, 5  ;;  %v3026_v37 = vld [vmem:[%s3737_s21 + $0x5c] sm:$0x1]  ;;  %v3012_v39 = vld [vmem:[%s3737_s21 + $0x24] sm:$0xf] }
  0xae   : > { %v1852_v57 = vrot.slane %v2948_v41, 5  ;;  %v2167_v58 = vshrl.u32 %v3021_v46, 16  ;;  %v2170_v59 = vshll.u32 %v3021_v46, 16  ;;  %v2176_v60 = vshll.u32 %v3022_v47, 16  ;;  %v3262_v40 = vld [vmem:[%s3737_s21 + $0x54] sm:$0xff]  }
  0xaf   : > { %1761 = vrot.lane.b32.xlu0 %v2936_v48, %s3383_s29  ;;  %1928 = vrot.lane.b32.xlu1 %v2979_v44, %s3384_s5  ;;  %v1881_v62 = vsel %vm3733_vm11, %v1879_v54, %v1880_v50  ;;  %v1850_v63 = vsel %vm3733_vm11, %v2968_v51, %v1849_v55  ;;  %v1851_v0 = vrot.slane %v1849_v55, 4  ;;  %v2180_v2 = vshrl.u32 %v3022_v47, 16  ;;  %v3013_v45 = vld [vmem:[%s3737_s21 + $0x28] sm:$0xf]  ;;  %v3014_v50 = vld [vmem:[%s3737_s21 + $0x2c] sm:$0x1] }
  0xb0   : > { %v2980_v30 = vcombine.low %v1878_v53, %v1881_v62  ;;  %v2169_v4 = vrot.slane %v2167_v58, 4  ;;  %v2172_v5 = vrot.slane %v2170_v59, 5  ;;  %v2178_v6 = vrot.slane %v2176_v60, 5  ;;  %v3053_v55 = vld [vmem:[%s3737_s21 + $0x48] sm:$0xe] }
  0xb1   : > { %v1853_v7 = vsel %vm3733_vm11, %v1851_v0, %v1852_v57  ;;  %v2182_v8 = vrot.slane %v2180_v2, 4  ;;  %v2186_v9 = vshll.u32 %v3023_v56, 16  ;;  %v2071_v11 = vshrl.u32 %v3009_v61, 16  ;;  %v3263_v56 = vld [vmem:[%s3737_s21 + $0x24] sm:$0xff]  }
  0xb2   : > { %v2976_v12 = vcombine.low %v1850_v63, %v1853_v7  ;;  %v2173_v13 = vor.u32 %v2172_v5, %v2169_v4  ;;  %v2074_v14 = vshll.u32 %v3009_v61, 16  ;;  %v2080_v15 = vshll.u32 %v3010_v1, 16  ;;  %v3054_v61 = vld [vmem:[%s3737_s21 + $0x4c] sm:$0xf]  ;;  %v3041_v7 = vld [vmem:[%s3737_s21 + $0x18] sm:$0xe] }
  0xb3   : > { %1920 = vrot.lane.b32.xlu0 %v2975_v52, %s3384_s5  ;;  %1930 = vrot.lane.b32.xlu1 %v2980_v30, %s3384_s5  ;;  %v2183_v18 = vor.u32 %v2182_v8, %v2178_v6  ;;  %v2188_v19 = vrot.slane %v2186_v9, 5  ;;  %v2073_v20 = vrot.slane %v2071_v11, 4  ;;  %v2084_v21 = vshrl.u32 %v3010_v1, 16  ;;  %v3055_v1 = vld [vmem:[%s3737_s21 + $0x50] sm:$0x1] }
  0xb4   : > { %v2174_v24 = vrot.slane %v2173_v13, 4  ;;  %v2076_v25 = vrot.slane %v2074_v14, 5  ;;  %v2082_v26 = vrot.slane %v2080_v15, 5  ;;  %v2090_v27 = vshll.u32 %v3011_v10, 16  ;;  %v3042_v8 = vld [vmem:[%s3737_s21 + $0x1c] sm:$0xf] }
  0xb5   : > { %v2184_v29 = vrot.slane %v2183_v18, 4  ;;  %v2086_v31 = vrot.slane %v2084_v21, 4  ;;  %v2191_v32 = vshrl.u32 %v3024_v16, 16  ;;  %v2194_v33 = vshll.u32 %v3024_v16, 16 }
  0xb6   : > { %v2179_v34 = vsel %vm3781_vm14, %v2174_v24, %v2178_v6  ;;  %v2077_v35 = vor.u32 %v2076_v25, %v2073_v20  ;;  %v2092_v36 = vrot.slane %v2090_v27, 5  ;;  %v2200_v38 = vshll.u32 %v3025_v23, 16 }
  0xb7   : > { %1922 = vrot.lane.b32.xlu0 %v2976_v12, %s3384_s5  ;;  %2021 = vrot.lane.b32.xlu1 %v3260_v17, %s3385_s6  ;;  %v2189_v41 = vsel %vm3781_vm14, %v2184_v29, %v2188_v19  ;;  %v2087_v42 = vor.u32 %v2086_v31, %v2082_v26  ;;  %v2193_v43 = vrot.slane %v2191_v32, 4  ;;  %v2196_v44 = vrot.slane %v2194_v33, 5  ;;  %v3043_v17 = vld [vmem:[%s3737_s21 + $0x20] sm:$0x1] }
  0xb8   : > { %v3037_v46 = vcombine.low %v2179_v34, %v2189_v41  ;;  %v2078_v47 = vrot.slane %v2077_v35, 4  ;;  %v2202_v48 = vrot.slane %v2200_v38, 5  ;;  %v2204_v49 = vshrl.u32 %v3025_v23, 16  ;;  %v1004_v23 = vld [vmem:[%s3737_s21 + $0x48] sm:$0xf] }
  0xb9   : > { %v2088_v51 = vrot.slane %v2087_v42, 4  ;;  %v2197_v52 = vor.u32 %v2196_v44, %v2193_v43  ;;  %v2210_v53 = vshll.u32 %v3026_v37, 16  ;;  %v2095_v54 = vshrl.u32 %v3012_v39, 16  ;;  %v1006_v34 = vld [vmem:[%s3737_s21 + $0x50] sm:$0x1] }
  0xba   : > { %v2083_v57 = vsel %vm3781_vm14, %v2078_v47, %v2082_v26  ;;  %v2206_v58 = vrot.slane %v2204_v49, 4  ;;  %v2098_v59 = vshll.u32 %v3012_v39, 16  ;;  %v2104_v60 = vshll.u32 %v3013_v45, 16  ;;  %v992_v39 = vld [vmem:[%s3737_s21 + $0x18] sm:$0xf] }
  0xbb   : > { %2013 = vrot.lane.b32.xlu0 %v3261_v28, %s3385_s6  ;;  %2023 = vrot.lane.b32.xlu1 %v3262_v40, %s3385_s6  ;;  %v2093_v62 = vsel %vm3781_vm14, %v2088_v51, %v2092_v36  ;;  %v2198_v63 = vrot.slane %v2197_v52, 4  ;;  %v2212_v0 = vrot.slane %v2210_v53, 5  ;;  %v2097_v2 = vrot.slane %v2095_v54, 4  ;;  %v1005_v28 = vld [vmem:[%s3737_s21 + $0x4c] sm:$0xf] }
  0xbc   : > { %v3033_v30 = vcombine.low %v2083_v57, %v2093_v62  ;;  %v2207_v4 = vor.u32 %v2206_v58, %v2202_v48  ;;  %v2100_v5 = vrot.slane %v2098_v59, 5  ;;  %v2106_v6 = vrot.slane %v2104_v60, 5  ;;  %v993_v44 = vld [vmem:[%s3737_s21 + $0x1c] sm:$0xf]  ;;  %v994_v49 = vld [vmem:[%s3737_s21 + $0x20] sm:$0x1] }
  0xbd   : > { %v2203_v9 = vsel %vm3781_vm14, %v2198_v63, %v2202_v48  ;;  %v2108_v10 = vshrl.u32 %v3013_v45, 16  ;;  %v2114_v11 = vshll.u32 %v3014_v50, 16  ;;  %v3069_v12 = vrot.slane %v3053_v55, 9  ;;  %v3056_v54 = vld [vmem:[%s3737_s21 + $0x54] sm:$0xe] }
  0xbe   : > { %v2208_v13 = vrot.slane %v2207_v4, 4  ;;  %v2101_v14 = vor.u32 %v2100_v5, %v2097_v2  ;;  %v2397_v15 = vrot.slane %v3054_v61, 5  ;;  %v2400_v16 = vrot.slane %v3055_v1, 5  ;;  %v3057_v55 = vld [vmem:[%s3737_s21 + $0x58] sm:$0xf]  ;;  %v3278_v61 = vld [vmem:[%s4365_s1] sm:$0xff]  }
  0xbf   : > { %2015 = vrot.lane.b32.xlu0 %v3263_v56, %s3385_s6  ;;  %2294 = vrot.lane.b32.xlu1 %v3037_v46, %s3386_s7  ;;  %v2110_v18 = vrot.slane %v2108_v10, 4  ;;  %v2116_v19 = vrot.slane %v2114_v11, 5  ;;  %v3065_v20 = vrot.slane %v3041_v7, 9  ;;  %v2369_v21 = vrot.slane %v3042_v8, 5  ;;  %v3058_v60 = vld [vmem:[%s3737_s21 + $0x5c] sm:$0x1] }
  0xc0   : > { %v2213_v24 = vsel %vm3781_vm14, %v2208_v13, %v2212_v0  ;;  %v2102_v25 = vrot.slane %v2101_v14, 4  ;;  %v2398_v26 = vsel %vm3733_vm11, %v3069_v12, %v2397_v15  ;;  %v2399_v27 = vrot.slane %v2397_v15, 4  ;;  %v3044_v1 = vld [vmem:[%s3737_s21 + $0x24] sm:$0xe]  ;;  %v3045_v7 = vld [vmem:[%s3737_s21 + $0x28] sm:$0xf]  ;;  %3145 = vmatprep.subr.bf16.mxu0 %v3278_v61  ;;  %3167 = vmatprep.subr.bf16.mxu1 %v3278_v61 }
  0xc1   : > { %v3038_v29 = vcombine.low %v2203_v9, %v2213_v24  ;;  %v2111_v31 = vor.u32 %v2110_v18, %v2106_v6  ;;  %v3926_v32 = vsel %vm3733_vm11, %v3065_v20, %v2369_v21  ;;  %v2371_v33 = vrot.slane %v2369_v21, 4  ;;  %v3046_v12 = vld [vmem:[%s3737_s21 + $0x2c] sm:$0x1]  ;;  %3146 = vmatpush3.bf16.msra.mxu0 %v3278_v61  ;;  %3170 = vmatpush3.bf16.msra.mxu1 %v3278_v61 }
  0xc2   : > { %v2107_v35 = vsel %vm3781_vm14, %v2102_v25, %v2106_v6  ;;  %v2401_v36 = vsel %vm3733_vm11, %v2399_v27, %v2400_v16  ;;  %v2372_v37 = vrot.slane %v3043_v17, 5  ;;  %v1158_v38 = vshrl.u32 %v1004_v23, 16  ;;  %v1007_v17 = vld [vmem:[%s3737_s21 + $0x54] sm:$0xf]  ;;  %v3279_v24 = vld [vmem:[%s4365_s1 + $0x8] sm:$0xff]  }
  0xc3   : > { %2286 = vrot.lane.b32.xlu0 %v3033_v30, %s3386_s7  ;;  %2296 = vrot.lane.b32.xlu1 %v3038_v29, %s3386_s7  ;;  %v2112_v40 = vrot.slane %v2111_v31, 4  ;;  %v3077_v41 = vcombine.low %v2398_v26, %v2401_v36  ;;  %v1161_v42 = vshll.u32 %v1004_v23, 16  ;;  %v1167_v43 = vshll.u32 %v1005_v28, 16  ;;  %v1008_v23 = vld [vmem:[%s3737_s21 + $0x58] sm:$0xf] }
  0xc4   : > { %v2373_v45 = vsel %vm3733_vm11, %v2371_v33, %v2372_v37  ;;  %v1160_v46 = vrot.slane %v1158_v38, 4  ;;  %v1171_v47 = vshrl.u32 %v1005_v28, 16  ;;  %v1177_v48 = vshll.u32 %v1006_v34, 16  ;;  %v1009_v29 = vld [vmem:[%s3737_s21 + $0x5c] sm:$0x1]  ;;  %3147 = vmatprep.subr.bf16.mxu0 %v3279_v24  ;;  %3168 = vmatprep.subr.bf16.mxu1 %v3279_v24 }
  0xc5   : > { %v2117_v50 = vsel %vm3781_vm14, %v2112_v40, %v2116_v19  ;;  %v3073_v51 = vcombine.low %v3926_v32, %v2373_v45  ;;  %v1163_v52 = vrot.slane %v1161_v42, 5  ;;  %v1169_v53 = vrot.slane %v1167_v43, 5  ;;  %v996_v36 = vld [vmem:[%s3737_s21 + $0x28] sm:$0xf]  ;;  %3148 = vmatpush3.bf16.msra.mxu0 %v3279_v24  ;;  %3171 = vmatpush3.bf16.msra.mxu1 %v3279_v24 }
  0xc6   : > { %v3034_v56 = vcombine.low %v2107_v35, %v2117_v50  ;;  %v1173_v57 = vrot.slane %v1171_v47, 4  ;;  %v1179_v58 = vrot.slane %v1177_v48, 5  ;;  %v1062_v59 = vshrl.u32 %v992_v39, 16  ;;  %v995_v35 = vld [vmem:[%s3737_s21 + $0x24] sm:$0xf] }
  0xc7   : > { %2455 = vrot.lane.b32.xlu1 %v3077_v41, %s3387_s10  ;;  %v1164_v62 = vor.u32 %v1163_v52, %v1160_v46  ;;  %v1065_v63 = vshll.u32 %v992_v39, 16  ;;  %v1071_v0 = vshll.u32 %v993_v44, 16  ;;  %v1075_v2 = vshrl.u32 %v993_v44, 16  ;;  %v1280_v50 = vld [vmem:[%s3737_s21 + $0x48] sm:$0xe] }
  0xc8   : > { %2288 = vrot.lane.b32.xlu0 %v3034_v56, %s3386_s7  ;;  %v1174_v30 = vor.u32 %v1173_v57, %v1169_v53  ;;  %v1064_v4 = vrot.slane %v1062_v59, 4  ;;  %v1081_v5 = vshll.u32 %v994_v49, 16  ;;  %v3070_v6 = vrot.slane %v3056_v54, 9  ;;  %v997_v49 = vld [vmem:[%s3737_s21 + $0x2c] sm:$0x1] }
  0xc9   : > { %v1165_v8 = vrot.slane %v1164_v62, 4  ;;  %v1067_v9 = vrot.slane %v1065_v63, 5  ;;  %v1073_v10 = vrot.slane %v1071_v0, 5  ;;  %v1077_v11 = vrot.slane %v1075_v2, 4  ;;  %v1268_v2 = vld [vmem:[%s3737_s21 + $0x18] sm:$0xe] }
  0xca   : > { %v1175_v13 = vrot.slane %v1174_v30, 4  ;;  %v1083_v14 = vrot.slane %v1081_v5, 5  ;;  %v2404_v15 = vrot.slane %v3057_v55, 5  ;;  %v2407_v16 = vrot.slane %v3058_v60, 5  ;;  %v1281_v55 = vld [vmem:[%s3737_s21 + $0x4c] sm:$0xf] }
  0xcb   : > { %v1170_v18 = vsel %vm3781_vm14, %v1165_v8, %v1169_v53  ;;  %v1068_v19 = vor.u32 %v1067_v9, %v1064_v4  ;;  %v1078_v20 = vor.u32 %v1077_v11, %v1073_v10  ;;  %v3066_v21 = vrot.slane %v3044_v1, 9  ;;  %v1282_v60 = vld [vmem:[%s3737_s21 + $0x50] sm:$0x1]  ;;  %v1270_v11 = vld [vmem:[%s3737_s21 + $0x20] sm:$0x1] }
  0xcc   : > { %2447 = vrot.lane.b32.xlu0 %v3073_v51, %s3387_s10  ;;  %v1180_v25 = vsel %vm3781_vm14, %v1175_v13, %v1179_v58  ;;  %v2405_v26 = vsel %vm3733_vm11, %v3070_v6, %v2404_v15  ;;  %v2406_v27 = vrot.slane %v2404_v15, 4  ;;  %v2376_v28 = vrot.slane %v3045_v7, 5  ;;  %v1269_v6 = vld [vmem:[%s3737_s21 + $0x1c] sm:$0xf] }
  0xcd   : > { %v2867_v31 = vcombine.low %v1170_v18, %v1180_v25  ;;  %v1069_v32 = vrot.slane %v1068_v19, 4  ;;  %v1079_v33 = vrot.slane %v1078_v20, 4  ;;  %v2379_v34 = vrot.slane %v3046_v12, 5 }
  0xce   : > { %v2408_v37 = vsel %vm3733_vm11, %v2406_v27, %v2407_v16  ;;  %v2377_v38 = vsel %vm3733_vm11, %v3066_v21, %v2376_v28  ;;  %v2378_v39 = vrot.slane %v2376_v28, 4  ;;  %v1182_v40 = vshrl.u32 %v1007_v17, 16  ;;  %v1283_v16 = vld [vmem:[%s3737_s21 + $0x54] sm:$0xe]  ;;  %v1284_v21 = vld [vmem:[%s3737_s21 + $0x58] sm:$0xf] }
  0xcf   : > { %1241 = vrot.lane.b32.xlu1 %v2867_v31, %s3381_s27  ;;  %v1074_v41 = vsel %vm3781_vm14, %v1069_v32, %v1073_v10  ;;  %v1084_v42 = vsel %vm3781_vm14, %v1079_v33, %v1083_v14  ;;  %v3078_v43 = vcombine.low %v2405_v26, %v2408_v37  ;;  %v1185_v44 = vshll.u32 %v1007_v17, 16  ;;  %v1271_v28 = vld [vmem:[%s3737_s21 + $0x24] sm:$0xe] }
  0xd0   : > { %v2863_v45 = vcombine.low %v1074_v41, %v1084_v42  ;;  %v2380_v46 = vsel %vm3733_vm11, %v2378_v39, %v2379_v34  ;;  %v1184_v47 = vrot.slane %v1182_v40, 4  ;;  %v1191_v48 = vshll.u32 %v1008_v23, 16  ;;  %v1272_v34 = vld [vmem:[%s3737_s21 + $0x28] sm:$0xf]  ;;  %v1273_v39 = vld [vmem:[%s3737_s21 + $0x2c] sm:$0x1] }
  0xd1   : > { %v3074_v51 = vcombine.low %v2377_v38, %v2380_v46  ;;  %v1187_v52 = vrot.slane %v1185_v44, 5  ;;  %v1195_v53 = vshrl.u32 %v1008_v23, 16  ;;  %v1201_v54 = vshll.u32 %v1009_v29, 16  ;;  %v1285_v23 = vld [vmem:[%s3737_s21 + $0x5c] sm:$0x1] }
  0xd2   : > { %1233 = vrot.lane.b32.xlu0 %v2863_v45, %s3381_s27  ;;  %v1193_v56 = vrot.slane %v1191_v48, 5  ;;  %v1086_v57 = vshrl.u32 %v995_v35, 16  ;;  %v1089_v58 = vshll.u32 %v995_v35, 16  ;;  %v1095_v59 = vshll.u32 %v996_v36, 16  ;;  %v2929_v44 = vld [vmem:[%s3737_s21 + $0x54] sm:$0xf] }
  0xd3   : > { %2457 = vrot.lane.b32.xlu1 %v3078_v43, %s3387_s10  ;;  %v1188_v61 = vor.u32 %v1187_v52, %v1184_v47  ;;  %v1197_v62 = vrot.slane %v1195_v53, 4  ;;  %v1203_v63 = vrot.slane %v1201_v54, 5  ;;  %v1099_v0 = vshrl.u32 %v996_v36, 16  ;;  %v2931_v54 = vld [vmem:[%s3737_s21 + $0x5c] sm:$0x1] }
  0xd4   : > { %v1088_v1 = vrot.slane %v1086_v57, 4  ;;  %v1091_v30 = vrot.slane %v1089_v58, 5  ;;  %v1097_v4 = vrot.slane %v1095_v59, 5  ;;  %v1105_v5 = vshll.u32 %v997_v49, 16  ;;  %v2930_v49 = vld [vmem:[%s3737_s21 + $0x58] sm:$0xf] }
  0xd5   : > { %v1189_v7 = vrot.slane %v1188_v61, 4  ;;  %v1198_v8 = vor.u32 %v1197_v62, %v1193_v56  ;;  %v1101_v9 = vrot.slane %v1099_v0, 4  ;;  %v2875_v10 = vrot.slane %v1280_v50, 9  ;;  %v2917_v59 = vld [vmem:[%s3737_s21 + $0x24] sm:$0xf] }
  0xd6   : > { %2449 = vrot.lane.b32.xlu0 %v3074_v51, %s3387_s10  ;;  %v1092_v12 = vor.u32 %v1091_v30, %v1088_v1  ;;  %v1107_v13 = vrot.slane %v1105_v5, 5  ;;  %v1357_v14 = vrot.slane %v1281_v55, 5  ;;  %v1360_v15 = vrot.slane %v1282_v60, 5  ;;  %v2918_v60 = vld [vmem:[%s3737_s21 + $0x28] sm:$0xf] }
  0xd7   : > { %v1194_v17 = vsel %vm3781_vm14, %v1189_v7, %v1193_v56  ;;  %v1199_v18 = vrot.slane %v1198_v8, 4  ;;  %v1102_v19 = vor.u32 %v1101_v9, %v1097_v4  ;;  %v2871_v20 = vrot.slane %v1268_v2, 9  ;;  %v2919_v2 = vld [vmem:[%s3737_s21 + $0x2c] sm:$0x1] }
  0xd8   : > { %v1093_v24 = vrot.slane %v1092_v12, 4  ;;  %v1358_v25 = vsel %vm3733_vm11, %v2875_v10, %v1357_v14  ;;  %v1359_v26 = vrot.slane %v1357_v14, 4  ;;  %v1329_v27 = vrot.slane %v1269_v6, 5  ;;  %v2932_v6 = vld [vmem:[%s3737_s21 + $0x60] sm:$0xf]  ;;  %v3264_v12 = vld [vmem:[%s3737_s21 + $0x54] sm:$0xff]  }
  0xd9   : > { %v1204_v29 = vsel %vm3781_vm14, %v1199_v18, %v1203_v63  ;;  %v1103_v31 = vrot.slane %v1102_v19, 4  ;;  %v1332_v32 = vrot.slane %v1270_v11, 5  ;;  %v2876_v33 = vrot.slane %v1283_v16, 9  ;;  %v2933_v11 = vld [vmem:[%s3737_s21 + $0x64] sm:$0xf] }
  0xda   : > { %v2868_v35 = vcombine.low %v1194_v17, %v1204_v29  ;;  %v1098_v36 = vsel %vm3781_vm14, %v1093_v24, %v1097_v4  ;;  %v1361_v37 = vsel %vm3733_vm11, %v1359_v26, %v1360_v15  ;;  %v1330_v38 = vsel %vm3733_vm11, %v2871_v20, %v1329_v27 }
  0xdb   : > { %v1108_v40 = vsel %vm3781_vm14, %v1103_v31, %v1107_v13  ;;  %v2883_v41 = vcombine.low %v1358_v25, %v1361_v37  ;;  %v1331_v42 = vrot.slane %v1329_v27, 4  ;;  %v1364_v43 = vrot.slane %v1284_v21, 5  ;;  %v2934_v25 = vld [vmem:[%s3737_s21 + $0x68] sm:$0x1]  ;;  %v2920_v27 = vld [vmem:[%s3737_s21 + $0x30] sm:$0xf] }
  0xdc   : > { %1243 = vrot.lane.b32.xlu1 %v2868_v35, %s3381_s27  ;;  %v2864_v45 = vcombine.low %v1098_v36, %v1108_v40  ;;  %v1367_v46 = vrot.slane %v1285_v23, 5  ;;  %v2872_v47 = vrot.slane %v1271_v28, 9  ;;  %v1336_v48 = vrot.slane %v1272_v34, 5 }
  0xdd   : > { %v1333_v50 = vsel %vm3733_vm11, %v1331_v42, %v1332_v32  ;;  %v1365_v51 = vsel %vm3733_vm11, %v2876_v33, %v1364_v43  ;;  %v1366_v52 = vrot.slane %v1364_v43, 4  ;;  %v1339_v53 = vrot.slane %v1273_v39, 5  ;;  %v3265_v33 = vld [vmem:[%s3737_s21 + $0x24] sm:$0xff]   ;;  %v2921_v42 = vld [vmem:[%s3737_s21 + $0x34] sm:$0xf] }
  0xde   : > { %1235 = vrot.lane.b32.xlu0 %v2864_v45, %s3381_s27  ;;  %v2879_v55 = vcombine.low %v1330_v38, %v1333_v50  ;;  %v1337_v56 = vsel %vm3733_vm11, %v2872_v47, %v1336_v48  ;;  %v1338_v57 = vrot.slane %v1336_v48, 4  ;;  %v1688_v58 = vshrl.u32 %v2929_v44, 16  ;;  %v3266_v43 = vld [vmem:[%s3737_s21 + $0x60] sm:$0xff]   ;;  %s3388_s27 = smov [#allocation4]  }
  0xdf   : > { %v1368_v61 = vsel %vm3733_vm11, %v1366_v52, %v1367_v46  ;;  %v1691_v62 = vshll.u32 %v2929_v44, 16  ;;  %v1697_v63 = vshll.u32 %v2930_v49, 16  ;;  %v1701_v0 = vshrl.u32 %v2930_v49, 16  ;;  %v3267_v44 = vld [vmem:[%s3737_s21 + $0x30] sm:$0xff]   ;;  %v2922_v52 = vld [vmem:[%s3737_s21 + $0x38] sm:$0x1] }
  0xe0   : > { %1405 = vrot.lane.b32.xlu1 %v2883_v41, %s3380_s24  ;;  %v2884_v1 = vcombine.low %v1365_v51, %v1368_v61  ;;  %v1340_v30 = vsel %vm3733_vm11, %v1338_v57, %v1339_v53  ;;  %v1690_v4 = vrot.slane %v1688_v58, 4  ;;  %v1707_v5 = vshll.u32 %v2931_v54, 16  ;;  %v2961_v58 = vld [vmem:[%s3737_s21 + $0x54] sm:$0xe] }
  0xe1   : > { %v2880_v7 = vcombine.low %v1337_v56, %v1340_v30  ;;  %v1693_v8 = vrot.slane %v1691_v62, 5  ;;  %v1699_v9 = vrot.slane %v1697_v63, 5  ;;  %v1703_v10 = vrot.slane %v1701_v0, 4  ;;  %v2963_v0 = vld [vmem:[%s3737_s21 + $0x5c] sm:$0x1] }
  0xe2   : > { %1397 = vrot.lane.b32.xlu0 %v2879_v55, %s3380_s24  ;;  %v1709_v13 = vrot.slane %v1707_v5, 5  ;;  %v1592_v14 = vshrl.u32 %v2917_v59, 16  ;;  %v1595_v15 = vshll.u32 %v2917_v59, 16  ;;  %v1601_v16 = vshll.u32 %v2918_v60, 16  ;;  %v2962_v59 = vld [vmem:[%s3737_s21 + $0x58] sm:$0xf] }
  0xe3   : > { %v1694_v17 = vor.u32 %v1693_v8, %v1690_v4  ;;  %v1704_v18 = vor.u32 %v1703_v10, %v1699_v9  ;;  %v1605_v19 = vshrl.u32 %v2918_v60, 16  ;;  %v1611_v20 = vshll.u32 %v2919_v2, 16  ;;  %v2949_v2 = vld [vmem:[%s3737_s21 + $0x24] sm:$0xe] }
  0xe4   : > { %1407 = vrot.lane.b32.xlu1 %v2884_v1, %s3380_s24  ;;  %v1594_v21 = vrot.slane %v1592_v14, 4  ;;  %v1597_v23 = vrot.slane %v1595_v15, 5  ;;  %v1603_v24 = vrot.slane %v1601_v16, 5  ;;  %v1712_v26 = vshrl.u32 %v2932_v6, 16  ;;  %v2964_v16 = vld [vmem:[%s3737_s21 + $0x60] sm:$0xe] }
  0xe5   : > { %v1695_v28 = vrot.slane %v1694_v17, 4  ;;  %v1705_v29 = vrot.slane %v1704_v18, 4  ;;  %v1607_v31 = vrot.slane %v1605_v19, 4  ;;  %v1613_v32 = vrot.slane %v1611_v20, 5  ;;  %v2965_v17 = vld [vmem:[%s3737_s21 + $0x64] sm:$0xf] }
  0xe6   : > { %1399 = vrot.lane.b32.xlu0 %v2880_v7, %s3380_s24  ;;  %v1598_v34 = vor.u32 %v1597_v23, %v1594_v21  ;;  %v1714_v35 = vrot.slane %v1712_v26, 4  ;;  %v1715_v36 = vshll.u32 %v2932_v6, 16  ;;  %v1721_v37 = vshll.u32 %v2933_v11, 16  ;;  %v2950_v6 = vld [vmem:[%s3737_s21 + $0x28] sm:$0xf] }
  0xe7   : > { %v1700_v38 = vsel %vm3781_vm14, %v1695_v28, %v1699_v9  ;;  %v1710_v39 = vsel %vm3781_vm14, %v1705_v29, %v1709_v13  ;;  %v1608_v40 = vor.u32 %v1607_v31, %v1603_v24  ;;  %v1725_v41 = vshrl.u32 %v2933_v11, 16  ;;  %v2951_v11 = vld [vmem:[%s3737_s21 + $0x2c] sm:$0x1]  ;;  %v2966_v23 = vld [vmem:[%s3737_s21 + $0x68] sm:$0x1] }
  0xe8   : > { %1498 = vrot.lane.b32.xlu1 %v3264_v12, %s3382_s28  ;;  %v2941_v45 = vcombine.low %v1700_v38, %v1710_v39  ;;  %v1599_v46 = vrot.slane %v1598_v34, 4  ;;  %v1717_v47 = vrot.slane %v1715_v36, 5  ;;  %v1723_v48 = vrot.slane %v1721_v37, 5  ;;  %v2952_v28 = vld [vmem:[%s3737_s21 + $0x30] sm:$0xe] }
  0xe9   : > { %v1609_v49 = vrot.slane %v1608_v40, 4  ;;  %v1727_v50 = vrot.slane %v1725_v41, 4  ;;  %v1731_v51 = vshll.u32 %v2934_v25, 16  ;;  %v1616_v53 = vshrl.u32 %v2920_v27, 16  ;;  %v2953_v34 = vld [vmem:[%s3737_s21 + $0x34] sm:$0xf] }
  0xea   : > { %1490 = vrot.lane.b32.xlu0 %v3265_v33, %s3382_s28  ;;  %v1604_v54 = vsel %vm3781_vm14, %v1599_v46, %v1603_v24  ;;  %v1718_v55 = vor.u32 %v1717_v47, %v1714_v35  ;;  %v1619_v56 = vshll.u32 %v2920_v27, 16  ;;  %v1625_v57 = vshll.u32 %v2921_v42, 16  ;;  %v2954_v39 = vld [vmem:[%s3737_s21 + $0x38] sm:$0x1]  ;;  %v3027_v40 = vld [vmem:[%s3737_s21 + $0x60] sm:$0xf] }
  0xeb   : > { %v1614_v60 = vsel %vm3781_vm14, %v1609_v49, %v1613_v32  ;;  %v1728_v61 = vor.u32 %v1727_v50, %v1723_v48  ;;  %v1733_v62 = vrot.slane %v1731_v51, 5  ;;  %v1618_v63 = vrot.slane %v1616_v53, 4  ;;  %v3029_v46 = vld [vmem:[%s3737_s21 + $0x68] sm:$0x1] }
  0xec   : > { %1500 = vrot.lane.b32.xlu1 %v3266_v43, %s3382_s28  ;;  %v2937_v1 = vcombine.low %v1604_v54, %v1614_v60  ;;  %v1719_v30 = vrot.slane %v1718_v55, 4  ;;  %v1621_v4 = vrot.slane %v1619_v56, 5  ;;  %v1627_v5 = vrot.slane %v1625_v57, 5  ;;  %v3015_v55 = vld [vmem:[%s3737_s21 + $0x30] sm:$0xf] }
  0xed   : > { %v1729_v7 = vrot.slane %v1728_v61, 4  ;;  %v1629_v8 = vshrl.u32 %v2921_v42, 16  ;;  %v1635_v9 = vshll.u32 %v2922_v52, 16  ;;  %v2973_v10 = vrot.slane %v2961_v58, 9  ;;  %v3016_v60 = vld [vmem:[%s3737_s21 + $0x34] sm:$0xf] }
  0xee   : > { %1492 = vrot.lane.b32.xlu0 %v3267_v44, %s3382_s28  ;;  %v1724_v12 = vsel %vm3781_vm14, %v1719_v30, %v1723_v48  ;;  %v1622_v13 = vor.u32 %v1621_v4, %v1618_v63  ;;  %v1884_v14 = vrot.slane %v2962_v59, 5  ;;  %v1887_v15 = vrot.slane %v2963_v0, 5  ;;  %s3287_s28 = sshll.u32 %s3388_s27, 4  ;;  %s3288_s28 = int_to_ptr.vmem [resolvable:$false] %s3287_s28 }
  0xef   : > { %v1734_v18 = vsel %vm3781_vm14, %v1729_v7, %v1733_v62  ;;  %v1631_v19 = vrot.slane %v1629_v8, 4  ;;  %v1637_v20 = vrot.slane %v1635_v9, 5  ;;  %v2969_v21 = vrot.slane %v2949_v2, 9  ;;  %v3017_v2 = vld [vmem:[%s3737_s21 + $0x38] sm:$0x1] }
  0xf0   : > { %1771 = vrot.lane.b32.xlu1 %v2941_v45, %s3383_s29  ;;  %v2942_v24 = vcombine.low %v1724_v12, %v1734_v18  ;;  %v1623_v25 = vrot.slane %v1622_v13, 4  ;;  %v1885_v26 = vsel %vm3733_vm11, %v2973_v10, %v1884_v14  ;;  %v1886_v27 = vrot.slane %v1884_v14, 4  ;;  %v3028_v45 = vld [vmem:[%s3737_s21 + $0x64] sm:$0xf]  ;;  %v3031_v7 = vld [vmem:[%s3737_s21 + $0x70] sm:$0xf] }
  0xf1   : > { %v1632_v29 = vor.u32 %v1631_v19, %v1627_v5  ;;  %v1856_v31 = vrot.slane %v2950_v6, 5  ;;  %v1859_v32 = vrot.slane %v2951_v11, 5  ;;  %v2974_v33 = vrot.slane %v2964_v16, 9 }
  0xf2   : > { %1763 = vrot.lane.b32.xlu0 %v2937_v1, %s3383_s29  ;;  %v1628_v35 = vsel %vm3781_vm14, %v1623_v25, %v1627_v5  ;;  %v1888_v36 = vsel %vm3733_vm11, %v1886_v27, %v1887_v15  ;;  %v1891_v37 = vrot.slane %v2965_v17, 5  ;;  %v1894_v38 = vrot.slane %v2966_v23, 5  ;;  %v3030_v1 = vld [vmem:[%s3737_s21 + $0x6c] sm:$0xf]  ;;  %v3268_v23 = vld [vmem:[%s3737_s21 + $0x60] sm:$0xff]  }
  0xf3   : > { %v1633_v41 = vrot.slane %v1632_v29, 4  ;;  %v2981_v42 = vcombine.low %v1885_v26, %v1888_v36  ;;  %v1857_v43 = vsel %vm3733_vm11, %v2969_v21, %v1856_v31  ;;  %v1858_v44 = vrot.slane %v1856_v31, 4  ;;  %v3032_v21 = vld [vmem:[%s3737_s21 + $0x74] sm:$0x1] }
  0xf4   : > { %1773 = vrot.lane.b32.xlu1 %v2942_v24, %s3383_s29  ;;  %v1892_v47 = vsel %vm3733_vm11, %v2974_v33, %v1891_v37  ;;  %v1893_v48 = vrot.slane %v1891_v37, 4  ;;  %v2970_v49 = vrot.slane %v2952_v28, 9  ;;  %v1863_v50 = vrot.slane %v2953_v34, 5  ;;  %v3018_v28 = vld [vmem:[%s3737_s21 + $0x3c] sm:$0xf] }
  0xf5   : > { %v1638_v51 = vsel %vm3781_vm14, %v1633_v41, %v1637_v20  ;;  %v1860_v52 = vsel %vm3733_vm11, %v1858_v44, %v1859_v32  ;;  %v1866_v53 = vrot.slane %v2954_v39, 5  ;;  %v2215_v54 = vshrl.u32 %v3027_v40, 16  ;;  %v3270_v41 = vld [vmem:[%s3737_s21 + $0x6c] sm:$0xff]  }
  0xf6   : > { %v2938_v56 = vcombine.low %v1628_v35, %v1638_v51  ;;  %v2977_v57 = vcombine.low %v1857_v43, %v1860_v52  ;;  %v1895_v58 = vsel %vm3733_vm11, %v1893_v48, %v1894_v38  ;;  %v1864_v59 = vsel %vm3733_vm11, %v2970_v49, %v1863_v50  ;;  %v3269_v35 = vld [vmem:[%s3737_s21 + $0x30] sm:$0xff]  }
  0xf7   : > { %v2982_v61 = vcombine.low %v1892_v47, %v1895_v58  ;;  %v1865_v62 = vrot.slane %v1863_v50, 4  ;;  %v2217_v63 = vrot.slane %v2215_v54, 4  ;;  %v2218_v0 = vshll.u32 %v3027_v40, 16  ;;  %v4103_v12 = vpop.permute.xlu1 %1401  ;;  %v3019_v40 = vld [vmem:[%s3737_s21 + $0x40] sm:$0xf] }
  0xf8   : > { %1765 = vrot.lane.b32.xlu0 %v2938_v56, %s3383_s29  ;;  %1932 = vrot.lane.b32.xlu1 %v2981_v42, %s3384_s5  ;;  %v2224_v30 = vshll.u32 %v3028_v45, 16  ;;  %v2228_v4 = vshrl.u32 %v3028_v45, 16  ;;  %v2234_v5 = vshll.u32 %v3029_v46, 16  ;;  %v2119_v6 = vshrl.u32 %v3015_v55, 16  ;;  %v3020_v46 = vld [vmem:[%s3737_s21 + $0x44] sm:$0x1] }
  0xf9   : > { %v1867_v8 = vsel %vm3733_vm11, %v1865_v62, %v1866_v53  ;;  %v2220_v9 = vrot.slane %v2218_v0, 5  ;;  %v2122_v10 = vshll.u32 %v3015_v55, 16  ;;  %v2128_v11 = vshll.u32 %v3016_v60, 16  ;;  %v4110_v32 = vpop.permute.xlu0 %1393  ;;  %v3059_v56 = vld [vmem:[%s3737_s21 + $0x60] sm:$0xe]  ;;  %s3289_s29 = scalar_lea.vmem %s3288_s28, 4096 }
  0xfa   : > { %v2978_v13 = vcombine.low %v1864_v59, %v1867_v8  ;;  %v2226_v14 = vrot.slane %v2224_v30, 5  ;;  %v2230_v15 = vrot.slane %v2228_v4, 4  ;;  %v2236_v16 = vrot.slane %v2234_v5, 5  ;;  %v3060_v62 = vld [vmem:[%s3737_s21 + $0x64] sm:$0xf] }
  0xfb   : > { %v2221_v17 = vor.u32 %v2220_v9, %v2217_v63  ;;  %v2121_v18 = vrot.slane %v2119_v6, 4  ;;  %v2124_v19 = vrot.slane %v2122_v10, 5  ;;  %v2130_v20 = vrot.slane %v2128_v11, 5  ;;  %v4120_v47 = vpop.permute.xlu1 %1403  ;;  %v3061_v63 = vld [vmem:[%s3737_s21 + $0x68] sm:$0x1] }
  0xfc   : > { %1924 = vrot.lane.b32.xlu0 %v2977_v57, %s3384_s5  ;;  %1934 = vrot.lane.b32.xlu1 %v2982_v61, %s3384_s5  ;;  %v2231_v24 = vor.u32 %v2230_v15, %v2226_v14  ;;  %v2132_v25 = vshrl.u32 %v3016_v60, 16  ;;  %v2138_v26 = vshll.u32 %v3017_v2, 16  ;;  %v2239_v27 = vshrl.u32 %v3030_v1, 16  ;;  %v3271_v57 = vld [vmem:[%s3737_s21 + $0x3c] sm:$0xff]   ;;  %v4140_v9 = vld [vmem:[%s3737_s21 + $0x30] sm:$0xe] }
  0xfd   : > { %v2222_v29 = vrot.slane %v2221_v17, 4  ;;  %v2125_v31 = vor.u32 %v2124_v19, %v2121_v18  ;;  %v2242_v33 = vshll.u32 %v3030_v1, 16  ;;  %v2248_v34 = vshll.u32 %v3031_v7, 16  ;;  %v4132_v4 = vpop.permute.xlu0 %1395  ;;  %v3048_v15 = vld [vmem:[%s3737_s21 + $0x34] sm:$0xf]  ;;  %v3272_v18 = vld [vmem:[%s3737_s21 + $0xc] sm:$0xff]  }
  0xfe   : > { %v2232_v36 = vrot.slane %v2231_v24, 4  ;;  %v2134_v37 = vrot.slane %v2132_v25, 4  ;;  %v2140_v38 = vrot.slane %v2138_v26, 5  ;;  %v2241_v39 = vrot.slane %v2239_v27, 4  ;;  %v3273_v19 = vld [vmem:[%s3737_s21] sm:$0xff]   ;;  %v3275_v26 = vld [vmem:[%s3737_s21 + $0x30] sm:$0xff]  }
  0xff   : > { %v2227_v42 = vsel %vm3781_vm14, %v2222_v29, %v2226_v14  ;;  %v2126_v43 = vrot.slane %v2125_v31, 4  ;;  %v2244_v44 = vrot.slane %v2242_v33, 5  ;;  %v4117_v45 = vrot.slane %v2248_v34, 5  ;;  %v3274_v25 = vld [vmem:[%s3737_s21 + $0x3c] sm:$0xff]   ;;  %v3276_v27 = vld [vmem:[%s3737_s21 + $0x48] sm:$0xff]   ;;  %979 = vst.msk [vmem:[#allocation3 + $0x8] sm:$0xff] %vm977_vm15, %v3272_v18 }
 0x100   : > { %1926 = vrot.lane.b32.xlu0 %v2978_v13, %s3384_s5  ;;  %2025 = vrot.lane.b32.xlu1 %v3268_v23, %s3385_s6  ;;  %v2237_v48 = vsel %vm3781_vm14, %v2232_v36, %v2236_v16  ;;  %v2135_v49 = vor.u32 %v2134_v37, %v2130_v20  ;;  %v2252_v50 = vshrl.u32 %v3031_v7, 16  ;;  %v2258_v51 = vshll.u32 %v3032_v21, 16  ;;  %v3049_v16 = vld [vmem:[%s3737_s21 + $0x38] sm:$0x1]  ;;  %v3281_v36 = vld [vmem:[%s3737_s21 + $0x24] sm:$0xff]   ;;  %978 = vst.msk [vmem:[#allocation3] sm:$0xff] %vm977_vm15, %v3273_v19 }
 0x101   : > { %v3039_v52 = vcombine.low %v2227_v42, %v2237_v48  ;;  %v2131_v53 = vsel %vm3781_vm14, %v2126_v43, %v2130_v20  ;;  %v2245_v54 = vor.u32 %v2244_v44, %v2241_v39  ;;  %v2143_v55 = vshrl.u32 %v3018_v28, 16  ;;  %v3277_v34 = vld [vmem:[%s3737_s21 + $0x18] sm:$0xff]   ;;  %v3063_v48 = vld [vmem:[%s3737_s21 + $0x70] sm:$0xf]  ;;  %983 = vst.msk [vmem:[#allocation3 + $0x28] sm:$0xff] %vm977_vm15, %v3274_v25  ;;  %982 = vst.msk [vmem:[#allocation3 + $0x20] sm:$0xff] %vm977_vm15, %v3275_v26 }
 0x102   : > { %v2136_v58 = vrot.slane %v2135_v49, 4  ;;  %v2254_v59 = vrot.slane %v2252_v50, 4  ;;  %v2260_v60 = vrot.slane %v2258_v51, 5  ;;  %v2146_v61 = vshll.u32 %v3018_v28, 16  ;;  %v3064_v49 = vld [vmem:[%s3737_s21 + $0x74] sm:$0x1] }
 0x103   : > { %v2246_v0 = vrot.slane %v2245_v54, 4  ;;  %v2145_v2 = vrot.slane %v2143_v55, 4  ;;  %v2152_v1 = vshll.u32 %v3019_v40, 16  ;;  %v2156_v30 = vshrl.u32 %v3019_v40, 16  ;;  %v1232_v17 = vpop.permute.xlu1 %1231  ;;  %984 = vst.msk [vmem:[#allocation3 + $0x30] sm:$0xff] %vm977_vm15, %v3276_v27  ;;  %980 = vst.msk [vmem:[#allocation3 + $0x10] sm:$0xff] %vm977_vm15, %v3277_v34 }
 0x104   : > { %2017 = vrot.lane.b32.xlu0 %v3269_v35, %s3385_s6  ;;  %2027 = vrot.lane.b32.xlu1 %v3270_v41, %s3385_s6  ;;  %v2141_v5 = vsel %vm3781_vm14, %v2136_v58, %v2140_v38  ;;  %v2255_v6 = vor.u32 %v2254_v59, %v4117_v45  ;;  %v2148_v7 = vrot.slane %v2146_v61, 5  ;;  %v2162_v8 = vshll.u32 %v3020_v46, 16  ;;  %v3280_v35 = vld [vmem:[%s3737_s21 + $0x54] sm:$0xff]   ;;  %v3062_v41 = vld [vmem:[%s3737_s21 + $0x6c] sm:$0xe]  ;;  %981 = vst.msk [vmem:[#allocation3 + $0x18] sm:$0xff] %vm977_vm15, %v3281_v36 }
 0x105   : > { %v3035_v10 = vcombine.low %v2131_v53, %v2141_v5  ;;  %v2251_v11 = vsel %vm3781_vm14, %v2246_v0, %v4117_v45  ;;  %v2154_v13 = vrot.slane %v2152_v1, 5  ;;  %v2158_v14 = vrot.slane %v2156_v30, 4  ;;  %v3051_v53 = vld [vmem:[%s3737_s21 + $0x40] sm:$0xf]  ;;  %985 = vst.msk [vmem:[#allocation3 + $0x38] sm:$0xff] %vm977_vm15, %v3280_v35  ;;  %s3094_s5 = sshll.u32 %s3361_s15, 4 }
 0x106   : > { %v2256_v20 = vrot.slane %v2255_v6, 4  ;;  %v2149_v21 = vor.u32 %v2148_v7, %v2145_v2  ;;  %v2164_v23 = vrot.slane %v2162_v8, 5  ;;  %v3071_v24 = vrot.slane %v3059_v56, 9  ;;  %1255 = vst.msk [vmem:[#allocation3 + $0x8] sm:$0xff] %vm1253_vm0, %v1232_v17 }
 0x107   : > { %v2159_v28 = vor.u32 %v2158_v14, %v2154_v13  ;;  %v2411_v29 = vrot.slane %v3060_v62, 5  ;;  %v2414_v31 = vrot.slane %v3061_v63, 5  ;;  %v3067_v33 = vrot.slane %v4140_v9, 9  ;;  %v1230_v46 = vpop.permute.xlu0 %1229  ;;  %1419 = vst.msk [vmem:[#allocation3 + $0x8] sm:$0xff] %vm1417_vm1, %v4132_v4 }
 0x108   : > { %2019 = vrot.lane.b32.xlu0 %v3271_v57, %s3385_s6  ;;  %2298 = vrot.lane.b32.xlu1 %v3039_v52, %s3386_s7  ;;  %v2261_v37 = vsel %vm3781_vm14, %v2256_v20, %v2260_v60  ;;  %v2150_v38 = vrot.slane %v2149_v21, 4  ;;  %v2383_v39 = vrot.slane %v3048_v15, 5  ;;  %v2386_v40 = vrot.slane %v3049_v16, 5  ;;  %v3050_v52 = vld [vmem:[%s3737_s21 + $0x3c] sm:$0xe]  ;;  %1254 = vst.msk [vmem:[#allocation3] sm:$0xff] %vm1253_vm0, %v1230_v46 }
 0x109   : > { %v3040_v42 = vcombine.low %v2251_v11, %v2261_v37  ;;  %v2160_v43 = vrot.slane %v2159_v28, 4  ;;  %v2412_v44 = vsel %vm3733_vm11, %v3071_v24, %v2411_v29  ;;  %v2413_v45 = vrot.slane %v2411_v29, 4  ;;  %v3052_v57 = vld [vmem:[%s3737_s21 + $0x44] sm:$0x1]  ;;  %1418 = vst.msk [vmem:[#allocation3] sm:$0xff] %vm1417_vm1, %v4110_v32  ;;  %s3095_s6 = sshll.u32 %s3365_s16, 5 }
 0x10a   : > { %v2155_v50 = vsel %vm3781_vm14, %v2150_v38, %v2154_v13  ;;  %v2385_v51 = vrot.slane %v2383_v39, 4  ;;  %v3072_v56 = vrot.slane %v3062_v41, 9  ;;  %v2384_v60 = vsel %vm3733_vm11, %v3067_v33, %v2383_v39  ;;  %v3282_v8 = vld [vmem:[%s4365_s1 + $0x10] ss:$0 sps:$4 sm:$0x33]   ;;  %s2690_s16 = sshll.u32 %s3492_s11, 4  ;;  %s4305_s16 = int_to_ptr.vmem [resolvable:$true] %s2690_s16 }
 0x10b   : > { %v2165_v54 = vsel %vm3781_vm14, %v2160_v43, %v2164_v23  ;;  %v2415_v55 = vsel %vm3733_vm11, %v2413_v45, %v2414_v31  ;;  %v1240_v58 = vpop.permute.xlu1 %1239  ;;  %v2418_v61 = vrot.slane %v3063_v48, 5  ;;  %v2421_v63 = vrot.slane %v3064_v49, 5  ;;  %3173 = vmatprep.subr.msk.bf16.mxu0 %vm2540_vm3, %v3282_v8  ;;  %3174 = vmatprep.subr.msk.bf16.mxu1 %vm2540_vm3, %v3282_v8  ;;  %s3283_s21 = scalar_lea.vmem %s4305_s16, 2048  ;;  %p3290_p4 = scmp.lt.s32.totalorder %s4305_s16, %s3288_s28 }
 0x10c   : > { %2290 = vrot.lane.b32.xlu0 %v3035_v10, %s3386_s7  ;;  %2300 = vrot.lane.b32.xlu1 %v3040_v42, %s3386_s7  ;;  %v3036_v3 = vcombine.low %v2155_v50, %v2165_v54  ;;  %v3079_v59 = vcombine.low %v2412_v44, %v2415_v55  ;;  %1259 = vst.msk [vmem:[#allocation3 + $0x28] sm:$0xff] %vm1253_vm0, %v1240_v58  ;;  %v3068_v0 = vrot.slane %v3050_v52, 9  ;;  %v2390_v2 = vrot.slane %v3051_v53, 5  ;;  %p3284_p0 = scmp.ne.s32.totalorder %s4305_s16, %s3283_s21  ;;  %p3291_p5 = scmp.lt.s32.totalorder %s3289_s29, %s3283_s21 }
 0x10d   : > { %v2387_v62 = vsel %vm3733_vm11, %v2385_v51, %v2386_v40  ;;  %v2419_v1 = vsel %vm3733_vm11, %v3072_v56, %v2418_v61  ;;  %v2420_v30 = vrot.slane %v2418_v61, 4  ;;  %v2393_v5 = vrot.slane %v3052_v57, 5  ;;  %1423 = vst.msk [vmem:[#allocation3 + $0x28] sm:$0xff] %vm1417_vm1, %v4120_v47 }
 0x10e   : > { %v2392_v6 = vrot.slane %v2390_v2, 4  ;;  %v3075_v9 = vcombine.low %v2384_v60, %v2387_v62  ;;  %v2391_v32 = vsel %vm3733_vm11, %v3068_v0, %v2390_v2  ;;  %v2542_v14 = vsel %vm2540_vm3, %v3282_v8, 0  ;;  %p3285_p1 = pnand %p3284_p0, %p3461_p3  ;;  %p3292_p6 = por %p3291_p5, %p3290_p4 }
 0x10f   : > { %v1495_v7 = vpop.permute.xlu1 %1494  ;;  %v2422_v10 = vsel %vm3733_vm11, %v2420_v30, %v2421_v63  ;;  %3150 = vmatpush3.bf16.msra.mxu0 %v2542_v14  ;;  %3172 = vmatpush3.bf16.msra.mxu1 %v2542_v14  ;;  %v3081_v14 = vld [vmem:[%s4366_s2] ss:$0 sm:$0xff] }
 0x110   : > { %2292 = vrot.lane.b32.xlu0 %v3036_v3, %s3386_s7  ;;  %2459 = vrot.lane.b32.xlu1 %v3079_v59, %s3387_s10  ;;  %v3080_v11 = vcombine.low %v2419_v1, %v2422_v10  ;;  %v2394_v4 = vsel %vm3733_vm11, %v2392_v6, %v2393_v5  ;;  %s2687_s7 = sadd.s32 %s3095_s6, %s3094_s5  ;;  %p3286_p2 = pneg %p3285_p1 }
 0x111   : > { %v1238_v47 = vpop.permute.xlu0 %1237  ;;  %v3076_v15 = vcombine.low %v2391_v32, %v2394_v4  ;;  %s3096_s15 = sshll.u32 %s2687_s7, 7 }
 0x112   : > { %1258 = vst.msk [vmem:[#allocation3 + $0x20] sm:$0xff] %vm1253_vm0, %v1238_v47  ;;  %s4302_s20 = scalar_lea.hbm %s4367_s3, %s3096_s15  ;;  %p3293_p7 = pnand %p3292_p6, %p3286_p2 }
 0x113   : > { %1422 = vst.msk [vmem:[#allocation3 + $0x20] sm:$0xff] %vm1417_vm1, %v4103_v12  ;;  %v1497_v13 = vpop.permute.xlu1 %1496 }
 0x114   : > { %2451 = vrot.lane.b32.xlu0 %v3075_v9, %s3387_s10  ;;  %2461 = vrot.lane.b32.xlu1 %v3080_v11, %s3387_s10  ;;  %1515 = vst.msk [vmem:[#allocation3 + $0x20] sm:$0xff] %vm1510_vm2, %v1495_v7  ;;  %1516 = vst.msk [vmem:[#allocation3 + $0x28] sm:$0xff] %vm1510_vm2, %v1497_v13 }
 0x115   : > { %v1487_v22 = vpop.permute.xlu0 %1486 }
 0x116   : > { %1511 = vst.msk [vmem:[#allocation3] sm:$0xff] %vm1510_vm2, %v1487_v22 }
 0x117   : > { %v1768_v12 = vpop.permute.xlu1 %1767 }
 0x118   : > { %2453 = vrot.lane.b32.xlu0 %v3076_v15, %s3387_s10  ;;  %1788 = vst.msk [vmem:[#allocation3 + $0x20] sm:$0xff] %vm1783_vm4, %v1768_v12 }
 0x119   : > { %v1489_v16 = vpop.permute.xlu0 %1488 }
 0x11a   : > { %1512 = vst.msk [vmem:[#allocation3 + $0x8] sm:$0xff] %vm1510_vm2, %v1489_v16 }
 0x11d   : > { %v1760_v17 = vpop.permute.xlu0 %1759  ;;  %v1770_v18 = vpop.permute.xlu1 %1769 }
 0x11e   : > { %1784 = vst.msk [vmem:[#allocation3] sm:$0xff] %vm1783_vm4, %v1760_v17  ;;  %1789 = vst.msk [vmem:[#allocation3 + $0x28] sm:$0xff] %vm1783_vm4, %v1770_v18 }
 0x121   : > { %v1762_v19 = vpop.permute.xlu0 %1761  ;;  %v1929_v20 = vpop.permute.xlu1 %1928 }
 0x122   : > { %1785 = vst.msk [vmem:[#allocation3 + $0x8] sm:$0xff] %vm1783_vm4, %v1762_v19 }
 0x123   : > { %1949 = vst.msk [vmem:[#allocation3 + $0x20] sm:$0xff] %vm1944_vm5, %v1929_v20 }
 0x125   : > { %v1921_v21 = vpop.permute.xlu0 %1920  ;;  %v1931_v23 = vpop.permute.xlu1 %1930 }
 0x126   : > { %1945 = vst.msk [vmem:[#allocation3] sm:$0xff] %vm1944_vm5, %v1921_v21  ;;  %1950 = vst.msk [vmem:[#allocation3 + $0x28] sm:$0xff] %vm1944_vm5, %v1931_v23 }
 0x129   : > { %v1923_v24 = vpop.permute.xlu0 %1922  ;;  %v2022_v25 = vpop.permute.xlu1 %2021 }
 0x12a   : > { %1946 = vst.msk [vmem:[#allocation3 + $0x8] sm:$0xff] %vm1944_vm5, %v1923_v24 }
 0x12b   : > { %2042 = vst.msk [vmem:[#allocation3 + $0x20] sm:$0xff] %vm2037_vm6, %v2022_v25 }
 0x12d   : > { %v2014_v26 = vpop.permute.xlu0 %2013  ;;  %v2024_v27 = vpop.permute.xlu1 %2023 }
 0x12e   : > { %2038 = vst.msk [vmem:[#allocation3] sm:$0xff] %vm2037_vm6, %v2014_v26  ;;  %2043 = vst.msk [vmem:[#allocation3 + $0x28] sm:$0xff] %vm2037_vm6, %v2024_v27 }
 0x131   : > { %v2016_v28 = vpop.permute.xlu0 %2015  ;;  %v2295_v29 = vpop.permute.xlu1 %2294 }
 0x132   : > { %2039 = vst.msk [vmem:[#allocation3 + $0x8] sm:$0xff] %vm2037_vm6, %v2016_v28 }
 0x133   : > { %2315 = vst.msk [vmem:[#allocation3 + $0x20] sm:$0xff] %vm2310_vm7, %v2295_v29 }
 0x135   : > { %v2287_v31 = vpop.permute.xlu0 %2286  ;;  %v2297_v33 = vpop.permute.xlu1 %2296 }
 0x136   : > { %2311 = vst.msk [vmem:[#allocation3] sm:$0xff] %vm2310_vm7, %v2287_v31  ;;  %2316 = vst.msk [vmem:[#allocation3 + $0x28] sm:$0xff] %vm2310_vm7, %v2297_v33 }
 0x139   : > { %v2456_v34 = vpop.permute.xlu1 %2455 }
 0x13a   : > { %v2289_v35 = vpop.permute.xlu0 %2288  ;;  %2476 = vst.msk [vmem:[#allocation3 + $0x20] sm:$0xff] %vm2471_vm8, %v2456_v34 }
 0x13b   : > { %2312 = vst.msk [vmem:[#allocation3 + $0x8] sm:$0xff] %vm2310_vm7, %v2289_v35 }
 0x13e   : > { %v2448_v36 = vpop.permute.xlu0 %2447 }
 0x13f   : > { %2472 = vst.msk [vmem:[#allocation3] sm:$0xff] %vm2471_vm8, %v2448_v36 }
 0x141   : > { %v1242_v37 = vpop.permute.xlu1 %1241  ;;  %v2484_v38 = vld [vmem:[#allocation3 + $0x20] sm:$0xff] }
 0x142   : > { %1260 = vst.msk [vmem:[#allocation3 + $0x30] sm:$0xff] %vm1253_vm0, %v1242_v37  ;;  %3159 = vmatprep.mubr.msk.bf16.mxu1 %vm2515_vm9, %v2484_v38 }
 0x144   : > { %v1234_v39 = vpop.permute.xlu0 %1233 }
 0x145   : > { %1256 = vst.msk [vmem:[#allocation3 + $0x10] sm:$0xff] %vm1253_vm0, %v1234_v39  ;;  %v2458_v40 = vpop.permute.xlu1 %2457 }
 0x146   : > { %2477 = vst.msk [vmem:[#allocation3 + $0x28] sm:$0xff] %vm2471_vm8, %v2458_v40  ;;  %v2480_v41 = vld [vmem:[#allocation3] sm:$0xff] }
 0x147   : > { %3151 = vmatprep.mubr.msk.bf16.mxu0 %vm2515_vm9, %v2480_v41 }
 0x148   : > { %v2450_v42 = vpop.permute.xlu0 %2449 }
 0x149   : > { %2473 = vst.msk [vmem:[#allocation3 + $0x8] sm:$0xff] %vm2471_vm8, %v2450_v42 }
 0x14d   : > { %v2485_v43 = vld [vmem:[#allocation3 + $0x28] sm:$0xff] }
 0x14e   : > { %v1244_v44 = vpop.permute.xlu1 %1243  ;;  %3160 = vmatmul.mubr.msk.bf16.vlgmr.msra.gmra.mrb[0].mxu1 %vm2515_vm9, %v2485_v43 }
 0x14f   : > { %1261 = vst.msk [vmem:[#allocation3 + $0x38] sm:$0xff] %vm1253_vm0, %v1244_v44 }
 0x150   : > { %v1236_v45 = vpop.permute.xlu0 %1235  ;;  %v2481_v46 = vld [vmem:[#allocation3 + $0x8] sm:$0xff] }
 0x151   : > { %1257 = vst.msk [vmem:[#allocation3 + $0x18] sm:$0xff] %vm1253_vm0, %v1236_v45  ;;  %3152 = vmatmul.mubr.msk.bf16.vlgmr.msra.gmra.mrb[0].mxu0 %vm2515_vm9, %v2481_v46 }
 0x152   : > { %v1406_v48 = vpop.permute.xlu1 %1405 }
 0x153   : > { %1424 = vst.msk [vmem:[#allocation3 + $0x30] sm:$0xff] %vm1417_vm1, %v1406_v48 }
 0x154   : > { %v1398_v49 = vpop.permute.xlu0 %1397 }
 0x155   : > { %1420 = vst.msk [vmem:[#allocation3 + $0x10] sm:$0xff] %vm1417_vm1, %v1398_v49 }
 0x156   : > { %v1408_v50 = vpop.permute.xlu1 %1407 }
 0x157   : > { %1425 = vst.msk [vmem:[#allocation3 + $0x38] sm:$0xff] %vm1417_vm1, %v1408_v50 }
 0x158   : > { %v1400_v51 = vpop.permute.xlu0 %1399 }
 0x159   : > { %1421 = vst.msk [vmem:[#allocation3 + $0x18] sm:$0xff] %vm1417_vm1, %v1400_v51 }
 0x15a   : > { %v1499_v52 = vpop.permute.xlu1 %1498 }
 0x15b   : > { %1517 = vst.msk [vmem:[#allocation3 + $0x30] sm:$0xff] %vm1510_vm2, %v1499_v52 }
 0x15c   : > { %v1491_v53 = vpop.permute.xlu0 %1490 }
 0x15d   : > { %1513 = vst.msk [vmem:[#allocation3 + $0x10] sm:$0xff] %vm1510_vm2, %v1491_v53 }
 0x15e   : > { %v1501_v54 = vpop.permute.xlu1 %1500 }
 0x15f   : > { %1518 = vst.msk [vmem:[#allocation3 + $0x38] sm:$0xff] %vm1510_vm2, %v1501_v54 }
 0x160   : > { %v1493_v55 = vpop.permute.xlu0 %1492 }
 0x161   : > { %1514 = vst.msk [vmem:[#allocation3 + $0x18] sm:$0xff] %vm1510_vm2, %v1493_v55 }
 0x162   : > { %v1772_v56 = vpop.permute.xlu1 %1771 }
 0x163   : > { %1790 = vst.msk [vmem:[#allocation3 + $0x30] sm:$0xff] %vm1783_vm4, %v1772_v56 }
 0x164   : > { %v1764_v57 = vpop.permute.xlu0 %1763 }
 0x165   : > { %1786 = vst.msk [vmem:[#allocation3 + $0x10] sm:$0xff] %vm1783_vm4, %v1764_v57 }
 0x166   : > { %v1774_v58 = vpop.permute.xlu1 %1773 }
 0x167   : > { %1791 = vst.msk [vmem:[#allocation3 + $0x38] sm:$0xff] %vm1783_vm4, %v1774_v58 }
 0x16a   : > { %v1766_v3 = vpop.permute.xlu0 %1765  ;;  %v1933_v59 = vpop.permute.xlu1 %1932 }
 0x16b   : > { %1787 = vst.msk [vmem:[#allocation3 + $0x18] sm:$0xff] %vm1783_vm4, %v1766_v3 }
 0x16c   : > { %1951 = vst.msk [vmem:[#allocation3 + $0x30] sm:$0xff] %vm1944_vm5, %v1933_v59 }
 0x16e   : > { %v1925_v60 = vpop.permute.xlu0 %1924  ;;  %v1935_v61 = vpop.permute.xlu1 %1934 }
 0x16f   : > { %1947 = vst.msk [vmem:[#allocation3 + $0x10] sm:$0xff] %vm1944_vm5, %v1925_v60  ;;  %1952 = vst.msk [vmem:[#allocation3 + $0x38] sm:$0xff] %vm1944_vm5, %v1935_v61 }
 0x172   : > { %v1927_v62 = vpop.permute.xlu0 %1926  ;;  %v2026_v63 = vpop.permute.xlu1 %2025 }
 0x173   : > { %1948 = vst.msk [vmem:[#allocation3 + $0x18] sm:$0xff] %vm1944_vm5, %v1927_v62 }
 0x174   : > { %2044 = vst.msk [vmem:[#allocation3 + $0x30] sm:$0xff] %vm2037_vm6, %v2026_v63 }
 0x176   : > { %v2018_v0 = vpop.permute.xlu0 %2017  ;;  %v2028_v2 = vpop.permute.xlu1 %2027 }
 0x177   : > { %2040 = vst.msk [vmem:[#allocation3 + $0x10] sm:$0xff] %vm2037_vm6, %v2018_v0  ;;  %2045 = vst.msk [vmem:[#allocation3 + $0x38] sm:$0xff] %vm2037_vm6, %v2028_v2 }
 0x17a   : > { %v2020_v1 = vpop.permute.xlu0 %2019  ;;  %v2299_v30 = vpop.permute.xlu1 %2298 }
 0x17b   : > { %2041 = vst.msk [vmem:[#allocation3 + $0x18] sm:$0xff] %vm2037_vm6, %v2020_v1 }
 0x17c   : > { %2317 = vst.msk [vmem:[#allocation3 + $0x30] sm:$0xff] %vm2310_vm7, %v2299_v30 }
 0x17e   : > { %v2291_v5 = vpop.permute.xlu0 %2290  ;;  %v2301_v6 = vpop.permute.xlu1 %2300 }
 0x17f   : > { %2313 = vst.msk [vmem:[#allocation3 + $0x10] sm:$0xff] %vm2310_vm7, %v2291_v5  ;;  %2318 = vst.msk [vmem:[#allocation3 + $0x38] sm:$0xff] %vm2310_vm7, %v2301_v6 }
 0x182   : > { %v2293_v7 = vpop.permute.xlu0 %2292  ;;  %v2460_v8 = vpop.permute.xlu1 %2459 }
 0x183   : > { %2314 = vst.msk [vmem:[#allocation3 + $0x18] sm:$0xff] %vm2310_vm7, %v2293_v7 }
 0x184   : > { %2478 = vst.msk [vmem:[#allocation3 + $0x30] sm:$0xff] %vm2471_vm8, %v2460_v8 }
 0x186   : > { %v2452_v9 = vpop.permute.xlu0 %2451  ;;  %v2462_v10 = vpop.permute.xlu1 %2461 }
 0x187   : > { %2474 = vst.msk [vmem:[#allocation3 + $0x10] sm:$0xff] %vm2471_vm8, %v2452_v9  ;;  %2479 = vst.msk [vmem:[#allocation3 + $0x38] sm:$0xff] %vm2471_vm8, %v2462_v10 }
 0x18a   : > { %v2454_v11 = vpop.permute.xlu0 %2453 }
 0x18b   : > { %v2486_v32 = vld [vmem:[#allocation3 + $0x30] sm:$0xff]  ;;  %2475 = vst.msk [vmem:[#allocation3 + $0x18] sm:$0xff] %vm2471_vm8, %v2454_v11 }
 0x18c   : > { %3163 = vmatprep.mubr.msk.bf16.mxu1 %vm2515_vm9, %v2486_v32 }
 0x18e   : > { %v2482_v4 = vld [vmem:[#allocation3 + $0x10] sm:$0xff]  ;;  %v2487_v47 = vld [vmem:[#allocation3 + $0x38] sm:$0xff] }
 0x18f   : > { %3155 = vmatprep.mubr.msk.bf16.mxu0 %vm2515_vm9, %v2482_v4  ;;  %3164 = vmatmul.mubr.msk.bf16.gmra.mrb[4].mxu1 %vm2515_vm9, %v2487_v47 }
 0x192   : > { %v2483_v13 = vld [vmem:[#allocation3 + $0x18] sm:$0xff] }
 0x193   : > { %3156 = vmatmul.mubr.msk.bf16.gmra.mrb[4].mxu0 %vm2515_vm9, %v2483_v13 }
 0x221   : > { %v3161_v15 = vpop.f32.mrb[0].mxu1 }
 0x222   : > { %v2619_v22 = vadd.f32 %v3161_v15, %v3081_v14  ;;  %v2610_v12 = vpop.f32.mrb[1].mxu1 }
 0x223   : > { %v2611_v16 = vadd.f32 %v3081_v14, %v2610_v12  ;;  %v3162_v17 = vpop.f32.mrb[2].mxu1 }
 0x224   : > { %v3153_v18 = vpop.f32.mrb[0].mxu0  ;;  %v2651_v19 = vmax.f32 %v2619_v22, 0.0  ;;  %v2622_v20 = vadd.f32 %v3162_v17, %v3081_v14  ;;  %v2613_v21 = vpop.f32.mrb[3].mxu1 }
 0x225   : > { %v2587_v23 = vadd.f32 %v3153_v18, %v3081_v14  ;;  %v2578_v24 = vpop.f32.mrb[1].mxu0  ;;  %v2649_v25 = vmax.f32 %v2611_v16, 0.0  ;;  %v2614_v26 = vadd.f32 %v3081_v14, %v2613_v21 }
 0x226   : > { %2667 = vst [vmem:[%s3492_s11 + $0x50] sm:$0xff] %v2651_v19  ;;  %v2579_v27 = vadd.f32 %v3081_v14, %v2578_v24  ;;  %v3154_v28 = vpop.f32.mrb[2].mxu0  ;;  %v2652_v29 = vmax.f32 %v2622_v20, 0.0 }
 0x227   : > { %v2643_v31 = vmax.f32 %v2587_v23, 0.0  ;;  %2665 = vst [vmem:[%s3492_s11 + $0x40] sm:$0xff] %v2649_v25  ;;  %v2590_v33 = vadd.f32 %v3154_v28, %v3081_v14  ;;  %v2581_v34 = vpop.f32.mrb[3].mxu0  ;;  %v2650_v35 = vmax.f32 %v2614_v26, 0.0 }
 0x228   : > { %v2641_v36 = vmax.f32 %v2579_v27, 0.0  ;;  %2668 = vst [vmem:[%s3492_s11 + $0x58] sm:$0xff] %v2652_v29  ;;  %v2582_v37 = vadd.f32 %v3081_v14, %v2581_v34 }
 0x229   : > { %2659 = vst [vmem:[%s3492_s11 + $0x10] sm:$0xff] %v2643_v31  ;;  %v2644_v38 = vmax.f32 %v2590_v33, 0.0  ;;  %2666 = vst [vmem:[%s3492_s11 + $0x48] sm:$0xff] %v2650_v35 }
 0x22a   : > { %2657 = vst [vmem:[%s3492_s11] sm:$0xff] %v2641_v36  ;;  %v2642_v39 = vmax.f32 %v2582_v37, 0.0 }
 0x22b   : > { %2660 = vst [vmem:[%s3492_s11 + $0x18] sm:$0xff] %v2644_v38 }
 0x22c   : > { %2658 = vst [vmem:[%s3492_s11 + $0x8] sm:$0xff] %v2642_v39 }
 0x262   : > { %v3165_v40 = vpop.f32.mrb[4].mxu1 }
 0x263   : > { %v2635_v41 = vadd.f32 %v3165_v40, %v3081_v14  ;;  %v2626_v42 = vpop.f32.mrb[5].mxu1 }
 0x264   : > { %v2627_v43 = vadd.f32 %v3081_v14, %v2626_v42  ;;  %v3166_v44 = vpop.f32.mrb[6].mxu1 }
 0x265   : > { %v2655_v45 = vmax.f32 %v2635_v41, 0.0  ;;  %v2638_v46 = vadd.f32 %v3166_v44, %v3081_v14  ;;  %v2629_v48 = vpop.f32.mrb[7].mxu1 }
 0x266   : > { %v3157_v49 = vpop.f32.mrb[4].mxu0  ;;  %v2653_v50 = vmax.f32 %v2627_v43, 0.0  ;;  %v2630_v51 = vadd.f32 %v3081_v14, %v2629_v48 }
 0x267   : > { %v2603_v52 = vadd.f32 %v3157_v49, %v3081_v14  ;;  %2671 = vst [vmem:[%s3492_s11 + $0x70] sm:$0xff] %v2655_v45  ;;  %v2594_v53 = vpop.f32.mrb[5].mxu0  ;;  %v2656_v54 = vmax.f32 %v2638_v46, 0.0 }
 0x268   : > { %v2595_v55 = vadd.f32 %v3081_v14, %v2594_v53  ;;  %2669 = vst [vmem:[%s3492_s11 + $0x60] sm:$0xff] %v2653_v50  ;;  %v3158_v56 = vpop.f32.mrb[6].mxu0  ;;  %v2654_v57 = vmax.f32 %v2630_v51, 0.0 }
 0x269   : > { %v2647_v58 = vmax.f32 %v2603_v52, 0.0  ;;  %v2606_v3 = vadd.f32 %v3158_v56, %v3081_v14  ;;  %2672 = vst [vmem:[%s3492_s11 + $0x78] sm:$0xff] %v2656_v54  ;;  %v2597_v59 = vpop.f32.mrb[7].mxu0 }
 0x26a   : > { %v2645_v60 = vmax.f32 %v2595_v55, 0.0  ;;  %v2598_v61 = vadd.f32 %v3081_v14, %v2597_v59  ;;  %2670 = vst [vmem:[%s3492_s11 + $0x68] sm:$0xff] %v2654_v57 }
 0x26b   : > { %2663 = vst [vmem:[%s3492_s11 + $0x30] sm:$0xff] %v2647_v58  ;;  %v2648_v62 = vmax.f32 %v2606_v3, 0.0 }
 0x26c   : > { %2661 = vst [vmem:[%s3492_s11 + $0x20] sm:$0xff] %v2645_v60  ;;  %v2646_v63 = vmax.f32 %v2598_v61, 0.0 }
 0x26d   : > { %2664 = vst [vmem:[%s3492_s11 + $0x38] sm:$0xff] %v2648_v62 }
 0x26e   : > { %2662 = vst [vmem:[%s3492_s11 + $0x28] sm:$0xff] %v2646_v63 }
 0x26f   : > { %3296 = shalt.err (!%p3293_p7)
}
 0x270   : > { %s3297_s4 = scalar_lea.hbm %s4302_s20, 2048  ;;  %s3301_s6 = scalar_lea.hbm %s4367_s3, 8192 }
 0x271   : > { %p3298_p9 = scmp.ne.s32.totalorder %s4302_s20, %s3297_s4  ;;  %p3302_p12 = scmp.lt.u32.totalorder %s4302_s20, %s4367_s3 }
 0x272   : > { %p3303_p13 = scmp.lt.u32.totalorder %s3301_s6, %s3297_s4  ;;  %p3305_p1 = scmp.lt.u32.totalorder %s3297_s4, %s4302_s20 }
 0x273   : > { %p3299_p10 = pnand %p3298_p9, %p3461_p3 }
 0x274   : > { %p3304_p0 = por %p3303_p13, %p3302_p12 }
 0x275   : > { %p3300_p11 = pneg %p3299_p10 }
 0x276   : > { %p3306_p2 = por %p3305_p1, %p3304_p0 }
 0x278   : > { %p3307_p4 = pnand %p3306_p2, %p3300_p11 }
 0x27a   : > { %3310 = shalt.err (!%p3307_p4)
}
 0x27b   : > { %s3389_s9 = smov 128  }
 0x27c   : > { %3175 = dma.vmem_to_hbm [thread:$0]  (%p3461_p3), %s4305_s16, 2048, %s4302_s20, %s4311_s8, %s3389_s9, %s3389_s9, %s3380_s24  }
 0x27d PF: > { %p3181_p5 = scmp.ge.s32.totalorder %s3377_s19, 2  ;;  %s2705_s10 = sand.u32 1, %s3349_s12  }
 0x27e   : > { %s2706_s21 = scalar_lea.sflag [#allocation5], %s2705_s10 }
 0x27f   : > { %p3178_p6 = pnand %p3181_p5, %p3470_p8 }
 0x281   : > { %3344 = dma.done.wait (!%p3178_p6), %s2706_s21, 2048  }
 0x282   : > { %3346 = vsyncadd (!%p3178_p6), %s2706_s21, 4294965248  ;;  %s16_s19 = sadd.s32 1, %s3377_s19   ;;  %s4382_s12 = smov %s3353_s13 }
 0x283   : > { %p13_p7 = scmp.ge.s32.totalorder %s16_s19, 6   ;;  %s4383_s13 = smov %s3357_s14 }
 0x284   : > { %s4384_s14 = smov %s3479_s30  ;;  %s4385_s15 = smov %s3369_s17 }
 0x285   : > { %s4386_s16 = smov %s3373_s18  ;;  %s4387_s17 = smov %s4390_s22 }
 0x286   : > { %s4388_s18 = smov %s4394_s23  ;;  %15 = sbr.rel (!%p13_p7) target bundleno = 5 (0x5), region = 86 }
 0x28d   :  { %2711 = vsyncpa [#allocation5], 1 }
 0x28e   :  { %2713 = vsyncpa [#allocation5 + $0x1], 1 }

</bundles_post_ra>
